<compile_context>
chip_gen: v5e
topology: v5e:2x2
jax: 0.10.0
libtpu: 0.0.40
codegen_flags: <defaults>
</compile_context>

<pallas_src>
import functools

import jax
import jax.numpy as jnp
from jax.experimental import pallas as pl
from jax.experimental.pallas import tpu as pltpu


# ----------------------------- Pallas kernels ------------------------------ #

def _mm_bias_relu_kernel(x_ref, w_ref, b_ref, o_ref):
    # x: (TM, K) bf16   w: (K, O_pad) bf16   b: (1, O_pad) f32   o: (TM, O_pad) bf16
    acc = jnp.dot(x_ref[...], w_ref[...], preferred_element_type=jnp.float32)
    acc = acc + b_ref[...]
    # Reference module uses nn.ReLU (not LeakyReLU).
    o_ref[...] = jnp.maximum(acc, 0.0).astype(o_ref.dtype)


def _head_matmul_kernel(h_ref, w_ref, o_ref):
    # h: (TN, Fp) bf16   w: (Fp, 128) bf16   o: (TN, 128) f32  (lane-dense MXU matmul)
    o_ref[...] = jnp.dot(h_ref[...], w_ref[...], preferred_element_type=jnp.float32)


# ------------------------------ glue helpers ------------------------------- #

def _round_up(x, m):
    return ((x + m - 1) // m) * m


def _pick_tile(m, target, mult=16):
    """Row tile: multiple of `mult`, divides the minimally padded row count,
    capped at `target`; splits huge single tiles so ("parallel",) can shard
    across v7x's two TensorCores."""
    mp = _round_up(m, mult)
    t = min(_round_up(target, mult), mp)
    while t > mult and mp % t:
        t -= mult
    if mp // t < 2 and t >= 128:           # prefer >= 2 grid steps for big tiles
        t2 = max(mult, (t // 2 // mult) * mult)
        while t2 > mult and mp % t2:
            t2 -= mult
        if t2 >= mult and mp % t2 == 0:
            t = t2
    return t, mp


def _maybe_buffered_spec(shape, index_map, depth):
    """BlockSpec with optional deeper pipelining; falls back to default."""
    if depth > 2 and hasattr(pl, "Buffered"):
        try:
            return pl.BlockSpec(shape, index_map, pipeline_mode=pl.Buffered(depth))
        except TypeError:
            pass
    return pl.BlockSpec(shape, index_map)


def conv2d_relu_pallas(x_nhwc, cin, w, b, *, stride=2, pad=2, tm_target=512):
    """x_nhwc: (N, H, W, Cp) NHWC, only the first `cin` channels are real
    (lane padding carried from the previous layer).  w: (O, cin, KH, KW) f32,
    b: (O,) f32.  Returns ((N, OH, OW, O_pad) bf16 with zero-padded channels, O).
    """
    n, h, win, _ = x_nhwc.shape
    o, _, kh, kw = w.shape

    # im2col (XLA glue).  The channel un-pad is part of the same fused
    # pad/slice/concat expression, so no standalone un-pad pass is emitted.
    xr = x_nhwc[..., :cin]
    xp = jnp.pad(xr, ((0, 0), (pad, pad), (pad, pad), (0, 0)))
    oh = (h + 2 * pad - kh) // stride + 1
    ow = (win + 2 * pad - kw) // stride + 1
    taps = [xp[:, i:i + stride * oh:stride, j:j + stride * ow:stride, :]
            for i in range(kh) for j in range(kw)]
    k = cin * kh * kw
    m = n * oh * ow
    xm = jnp.concatenate(taps, axis=-1).reshape(m, k).astype(jnp.bfloat16)
    # TODO(synk): im2col materialized in HBM (~6.25x duplication); in-kernel
    # tap extraction left for a follow-up (needs robust strided in-kernel slicing).

    # Weights (O, C, KH, KW) -> (KH, KW, C, O) -> (K, O); O padded to 128 lanes
    # so the kernel's stores are lane-dense (padding contributes exact zeros).
    o_pad = _round_up(o, 128)
    wm = w.transpose(2, 3, 1, 0).reshape(k, o)
    wm = jnp.pad(wm, ((0, 0), (0, o_pad - o))).astype(jnp.bfloat16)
    bm = jnp.pad(b, (0, o_pad - o)).reshape(1, o_pad).astype(jnp.float32)

    tm, mp = _pick_tile(m, tm_target, mult=16)   # bf16 sublane packing
    if mp != m:
        xm = jnp.pad(xm, ((0, mp - m), (0, 0)))
    steps = mp // tm

    out = pl.pallas_call(
        _mm_bias_relu_kernel,
        out_shape=jax.ShapeDtypeStruct((mp, o_pad), jnp.bfloat16),
        grid=(steps,),
        in_specs=[
            _maybe_buffered_spec((tm, k), lambda i: (i, 0),
                                 3 if steps >= 8 else 2),
            pl.BlockSpec((k, o_pad), lambda i: (0, 0)),
            pl.BlockSpec((1, o_pad), lambda i: (0, 0)),
        ],
        out_specs=pl.BlockSpec((tm, o_pad), lambda i: (i, 0)),
        compiler_params=pltpu.CompilerParams(
            dimension_semantics=("parallel",),
            vmem_limit_bytes=32 * 1024 * 1024),
    )(xm, wm, bm)

    if mp != m:
        out = out[:m]
    return out.reshape(n, oh, ow, o_pad), o


def head_scores_pallas(h_flat, w_head_t, *, tn_target=512):
    """h_flat: (N, Fp) bf16; w_head_t: (Fp, 128) bf16 -> (N, 128) f32 scores."""
    n, fp = h_flat.shape
    tn, npad = _pick_tile(n, tn_target, mult=16)
    if npad != n:
        h_flat = jnp.pad(h_flat, ((0, npad - n), (0, 0)))
    steps = npad // tn
    out = pl.pallas_call(
        _head_matmul_kernel,
        out_shape=jax.ShapeDtypeStruct((npad, 128), jnp.float32),
        grid=(steps,),
        in_specs=[
            _maybe_buffered_spec((tn, fp), lambda i: (i, 0),
                                 3 if steps >= 8 else 2),
            pl.BlockSpec((fp, 128), lambda i: (0, 0)),
        ],
        out_specs=pl.BlockSpec((tn, 128), lambda i: (i, 0)),
        compiler_params=pltpu.CompilerParams(
            dimension_semantics=("parallel",),
            vmem_limit_bytes=32 * 1024 * 1024),
    )(h_flat, w_head_t)
    return out[:n]


# --------------------------- SpectralNorm (glue) ---------------------------- #

def _l2norm(v, eps=1e-12):
    return v / (jnp.linalg.norm(v) + eps)


def spectral_norm(w, u, power_iterations=1):
    """One-step power-iteration spectral normalization (as in GS-WGAN).

    Note: the stored `u` vectors are not updated/persisted here (PyTorch's
    SpectralNorm updates them in place each forward) — forward value for the
    current state is identical.
    """
    height = w.shape[0]
    w_mat = w.reshape(height, -1)
    v = None
    for _ in range(power_iterations):
        v = _l2norm(w_mat.T @ u)
        u = _l2norm(w_mat @ v)
    sigma = u @ (w_mat @ v)
    return w / sigma


# ------------------------------ model params -------------------------------- #

def init_params(key, c=1, img_size=28, model_dim=16, num_classes=10):
    if img_size == 28:
        final_dim = 4 * 4 * 4 * model_dim
    else:
        final_dim = 4 * img_size * img_size * model_dim // 8 // 8
    ks = jax.random.split(key, 11)

    def conv_init(kk, o, ci, ksz):
        fan_in = ci * ksz * ksz
        bound = 1.0 / float(fan_in) ** 0.5
        kw_, kb_ = jax.random.split(kk)
        w = jax.random.uniform(kw_, (o, ci, ksz, ksz), jnp.float32, -bound, bound)
        bb = jax.random.uniform(kb_, (o,), jnp.float32, -bound, bound)
        return w, bb

    w1, b1 = conv_init(ks[0], model_dim, c, 5)
    w2, b2 = conv_init(ks[1], model_dim * 2, model_dim, 5)
    w3, b3 = conv_init(ks[2], model_dim * 4, model_dim * 2, 5)
    bound = 1.0 / float(final_dim) ** 0.5
    w_lin = jax.random.uniform(ks[3], (1, final_dim), jnp.float32, -bound, bound)
    b_lin = jax.random.uniform(ks[4], (1,), jnp.float32, -bound, bound)
    w_emb = jax.random.normal(ks[5], (num_classes, final_dim), jnp.float32)
    # deterministic SpectralNorm power-iteration vectors (stored "u")
    u1 = _l2norm(jax.random.normal(ks[6], (model_dim,), jnp.float32))
    u2 = _l2norm(jax.random.normal(ks[7], (model_dim * 2,), jnp.float32))
    u3 = _l2norm(jax.random.normal(ks[8], (model_dim * 4,), jnp.float32))
    u_lin = _l2norm(jax.random.normal(ks[9], (1,), jnp.float32))
    u_emb = _l2norm(jax.random.normal(ks[10], (num_classes,), jnp.float32))
    return dict(w1=w1, b1=b1, w2=w2, b2=b2, w3=w3, b3=b3,
                w_lin=w_lin, b_lin=b_lin, w_emb=w_emb,
                u1=u1, u2=u2, u3=u3, u_lin=u_lin, u_emb=u_emb)


# -------------------------------- forward ----------------------------------- #

def discriminator_forward(params, x, y, *, c, img_size):
    # NOTE: convs/head run bf16 operands with f32 accumulation; the PyTorch
    # reference is f32 end-to-end, so comparisons need a relaxed tolerance.
    x = x.reshape(-1, c, img_size, img_size)
    n = x.shape[0]

    # SpectralNorm weight rescaling (parameter setup, plain JAX glue).
    w1 = spectral_norm(params["w1"], params["u1"])
    w2 = spectral_norm(params["w2"], params["u2"])
    w3 = spectral_norm(params["w3"], params["u3"])
    w_lin = spectral_norm(params["w_lin"], params["u_lin"])
    w_emb = spectral_norm(params["w_emb"], params["u_emb"])

    # Single NCHW -> NHWC transpose of the raw input; downstream stays NHWC
    # with 128-lane-padded channels carried between layers.
    h = x.transpose(0, 2, 3, 1).astype(jnp.bfloat16)
    h, o1 = conv2d_relu_pallas(h, c, w1, params["b1"])    # (N, 14, 14, 128)
    h, o2 = conv2d_relu_pallas(h, o1, w2, params["b2"])   # (N,  7,  7, 128)
    h, o3 = conv2d_relu_pallas(h, o2, w3, params["b3"])   # (N,  4,  4, O3p)

    _, hh, ww, o3p = h.shape
    fp = hh * ww * o3p
    h_flat = h.reshape(n, fp)       # free row-major reshape (channels stay padded)

    # Class-conditional head as one lane-dense MXU matmul:
    #   scores = h_flat @ [w_lin ; w_emb]^T, rows (1+num_classes) padded -> 128.
    # Head-weight columns are permuted ONCE from PyTorch (C,H,W) flatten order
    # into the padded NHWC-flat order (zeros over padded channels), so there is
    # no per-sample embedding gather and no (N,F) `we` materialization.
    w_cat = jnp.concatenate([w_lin, w_emb], axis=0)                  # (R, F)
    r = w_cat.shape[0]
    assert r <= 128
    c_pad = jnp.arange(o3p)
    t_idx = (c_pad[None, None, :] * (hh * ww)
             + jnp.arange(hh)[:, None, None] * ww
             + jnp.arange(ww)[None, :, None])                        # (hh, ww, o3p)
    valid_c = c_pad < o3
    t_safe = jnp.where(valid_c[None, None, :], t_idx, 0).reshape(-1)  # (fp,)
    valid_flat = jnp.tile(valid_c, hh * ww)                           # (fp,)
    w_head = jnp.where(valid_flat[None, :], w_cat[:, t_safe], 0.0)    # (R, fp)
    w_head_t = jnp.pad(w_head.T, ((0, 0), (0, 128 - r))).astype(jnp.bfloat16)

    scores = head_scores_pallas(h_flat, w_head_t)                     # (N, 128) f32
    sel = jnp.take_along_axis(scores, (y + 1)[:, None], axis=1)[:, 0]
    return scores[:, 0] + params["b_lin"][0] + sel                    # out.view(-1)


if __name__ == "__main__":
    root = jax.random.PRNGKey(0)
    k_params, k_x, k_y = jax.random.split(root, 3)
    batch, c, img_size, model_dim, num_classes = 2, 1, 28, 16, 10

    params = init_params(k_params, c=c, img_size=img_size,
                         model_dim=model_dim, num_classes=num_classes)
    x = jax.random.normal(k_x, (batch, c, img_size, img_size), jnp.float32)
    y = jax.random.randint(k_y, (batch,), 0, num_classes)

    fwd = jax.jit(functools.partial(discriminator_forward, c=c, img_size=img_size))
    out = fwd(params, x, y)
    out = jax.block_until_ready(out)
    assert out.shape == (batch,) and out.dtype == jnp.float32
    print("KERNEL_OK")
</pallas_src>

<mosaic_0001>
module attributes {stable_mosaic.version = 11 : i64} {
  func.func @_mm_bias_relu_kernel(%arg0: i32, %arg1: memref<80x25xbf16, #tpu.memory_space<vmem>>, %arg2: memref<25x128xbf16, #tpu.memory_space<vmem>>, %arg3: memref<1x128xf32, #tpu.memory_space<vmem>>, %arg4: memref<80x128xbf16, #tpu.memory_space<vmem>>) attributes {dimension_semantics = [#tpu.dimension_semantics<parallel>], iteration_bounds = array<i64: 5>, scalar_prefetch = 0 : i64, scratch_operands = 0 : i64, tpu.core_type = #tpu.core_type<tc>, window_params = [{transform_indices = @transform_0, window_bounds = array<i64: 80, 25>}, {pipeline_mode = #tpu.pipeline_mode<synchronous>, transform_indices = @transform_1, window_bounds = array<i64: 25, 128>}, {pipeline_mode = #tpu.pipeline_mode<synchronous>, transform_indices = @transform_2, window_bounds = array<i64: 1, 128>}, {transform_indices = @transform_3, window_bounds = array<i64: 80, 128>}]} {
    %c0 = arith.constant 0 : index
    %c0_0 = arith.constant 0 : index
    %0 = vector.load %arg1[%c0, %c0_0] : memref<80x25xbf16, #tpu.memory_space<vmem>>, vector<80x25xbf16>
    %c0_1 = arith.constant 0 : index
    %c0_2 = arith.constant 0 : index
    %1 = vector.load %arg2[%c0_1, %c0_2] : memref<25x128xbf16, #tpu.memory_space<vmem>>, vector<25x128xbf16>
    %cst = arith.constant dense<0.000000e+00> : vector<80x128xf32>
    %2 = tpu.matmul %0, %1, %cst {dimension_numbers = #tpu.dot_dimension_numbers<[1], [0], [0], [1], [0, 0, 1, 1], [], []>} : vector<80x25xbf16>, vector<25x128xbf16>, vector<80x128xf32> -> vector<80x128xf32>
    %c0_3 = arith.constant 0 : index
    %c0_4 = arith.constant 0 : index
    %3 = vector.load %arg3[%c0_3, %c0_4] : memref<1x128xf32, #tpu.memory_space<vmem>>, vector<1x128xf32>
    %4 = vector.broadcast %3 : vector<1x128xf32> to vector<80x128xf32>
    %5 = arith.addf %2, %4 : vector<80x128xf32>
    %cst_5 = arith.constant 0.000000e+00 : f32
    %6 = vector.broadcast %cst_5 : f32 to vector<80x128xf32>
    %7 = arith.maximumf %5, %6 : vector<80x128xf32>
    %8 = arith.truncf %7 : vector<80x128xf32> to vector<80x128xbf16>
    %c0_6 = arith.constant 0 : index
    %c0_7 = arith.constant 0 : index
    %9 = vector.load %arg4[%c0_6, %c0_7] : memref<80x128xbf16, #tpu.memory_space<vmem>>, vector<80x128xbf16>
    tpu.vector_store %arg4[%c0_6, %c0_7], %8 {strides = array<i32>} : memref<80x128xbf16, #tpu.memory_space<vmem>>, vector<80x128xbf16>,
    return
  }
  func.func @transform_0(%arg0: i32) -> (i32, i32) {
    %c0_i32 = arith.constant 0 : i32
    %c0_i32_0 = arith.constant 0 : i32
    return %arg0, %c0_i32 : i32, i32
  }
  func.func @transform_1(%arg0: i32) -> (i32, i32) {
    %c0_i32 = arith.constant 0 : i32
    %c0_i32_0 = arith.constant 0 : i32
    %c0_i32_1 = arith.constant 0 : i32
    return %c0_i32, %c0_i32_0 : i32, i32
  }
  func.func @transform_2(%arg0: i32) -> (i32, i32) {
    %c0_i32 = arith.constant 0 : i32
    %c0_i32_0 = arith.constant 0 : i32
    %c0_i32_1 = arith.constant 0 : i32
    return %c0_i32, %c0_i32_0 : i32, i32
  }
  func.func @transform_3(%arg0: i32) -> (i32, i32) {
    %c0_i32 = arith.constant 0 : i32
    %c0_i32_0 = arith.constant 0 : i32
    return %arg0, %c0_i32 : i32, i32
  }
}

module attributes {stable_mosaic.version = 11 : i64} {
  func.func @_mm_bias_relu_kernel(%arg0: i32, %arg1: memref<112x400xbf16, #tpu.memory_space<vmem>>, %arg2: memref<400x128xbf16, #tpu.memory_space<vmem>>, %arg3: memref<1x128xf32, #tpu.memory_space<vmem>>, %arg4: memref<112x128xbf16, #tpu.memory_space<vmem>>) attributes {dimension_semantics = [#tpu.dimension_semantics<parallel>], iteration_bounds = array<i64: 1>, scalar_prefetch = 0 : i64, scratch_operands = 0 : i64, tpu.core_type = #tpu.core_type<tc>, window_params = [{transform_indices = @transform_0, window_bounds = array<i64: 112, 400>}, {pipeline_mode = #tpu.pipeline_mode<synchronous>, transform_indices = @transform_1, window_bounds = array<i64: 400, 128>}, {pipeline_mode = #tpu.pipeline_mode<synchronous>, transform_indices = @transform_2, window_bounds = array<i64: 1, 128>}, {transform_indices = @transform_3, window_bounds = array<i64: 112, 128>}]} {
    %c0 = arith.constant 0 : index
    %c0_0 = arith.constant 0 : index
    %0 = vector.load %arg1[%c0, %c0_0] : memref<112x400xbf16, #tpu.memory_space<vmem>>, vector<112x400xbf16>
    %c0_1 = arith.constant 0 : index
    %c0_2 = arith.constant 0 : index
    %1 = vector.load %arg2[%c0_1, %c0_2] : memref<400x128xbf16, #tpu.memory_space<vmem>>, vector<400x128xbf16>
    %cst = arith.constant dense<0.000000e+00> : vector<112x128xf32>
    %2 = tpu.matmul %0, %1, %cst {dimension_numbers = #tpu.dot_dimension_numbers<[1], [0], [0], [1], [0, 0, 1, 1], [], []>} : vector<112x400xbf16>, vector<400x128xbf16>, vector<112x128xf32> -> vector<112x128xf32>
    %c0_3 = arith.constant 0 : index
    %c0_4 = arith.constant 0 : index
    %3 = vector.load %arg3[%c0_3, %c0_4] : memref<1x128xf32, #tpu.memory_space<vmem>>, vector<1x128xf32>
    %4 = vector.broadcast %3 : vector<1x128xf32> to vector<112x128xf32>
    %5 = arith.addf %2, %4 : vector<112x128xf32>
    %cst_5 = arith.constant 0.000000e+00 : f32
    %6 = vector.broadcast %cst_5 : f32 to vector<112x128xf32>
    %7 = arith.maximumf %5, %6 : vector<112x128xf32>
    %8 = arith.truncf %7 : vector<112x128xf32> to vector<112x128xbf16>
    %c0_6 = arith.constant 0 : index
    %c0_7 = arith.constant 0 : index
    %9 = vector.load %arg4[%c0_6, %c0_7] : memref<112x128xbf16, #tpu.memory_space<vmem>>, vector<112x128xbf16>
    tpu.vector_store %arg4[%c0_6, %c0_7], %8 {strides = array<i32>} : memref<112x128xbf16, #tpu.memory_space<vmem>>, vector<112x128xbf16>,
    return
  }
  func.func @transform_0(%arg0: i32) -> (i32, i32) {
    %c0_i32 = arith.constant 0 : i32
    %c0_i32_0 = arith.constant 0 : i32
    return %arg0, %c0_i32 : i32, i32
  }
  func.func @transform_1(%arg0: i32) -> (i32, i32) {
    %c0_i32 = arith.constant 0 : i32
    %c0_i32_0 = arith.constant 0 : i32
    %c0_i32_1 = arith.constant 0 : i32
    return %c0_i32, %c0_i32_0 : i32, i32
  }
  func.func @transform_2(%arg0: i32) -> (i32, i32) {
    %c0_i32 = arith.constant 0 : i32
    %c0_i32_0 = arith.constant 0 : i32
    %c0_i32_1 = arith.constant 0 : i32
    return %c0_i32, %c0_i32_0 : i32, i32
  }
  func.func @transform_3(%arg0: i32) -> (i32, i32) {
    %c0_i32 = arith.constant 0 : i32
    %c0_i32_0 = arith.constant 0 : i32
    return %arg0, %c0_i32 : i32, i32
  }
}

module attributes {stable_mosaic.version = 11 : i64} {
  func.func @_mm_bias_relu_kernel(%arg0: i32, %arg1: memref<32x800xbf16, #tpu.memory_space<vmem>>, %arg2: memref<800x128xbf16, #tpu.memory_space<vmem>>, %arg3: memref<1x128xf32, #tpu.memory_space<vmem>>, %arg4: memref<32x128xbf16, #tpu.memory_space<vmem>>) attributes {dimension_semantics = [#tpu.dimension_semantics<parallel>], iteration_bounds = array<i64: 1>, scalar_prefetch = 0 : i64, scratch_operands = 0 : i64, tpu.core_type = #tpu.core_type<tc>, window_params = [{transform_indices = @transform_0, window_bounds = array<i64: 32, 800>}, {pipeline_mode = #tpu.pipeline_mode<synchronous>, transform_indices = @transform_1, window_bounds = array<i64: 800, 128>}, {pipeline_mode = #tpu.pipeline_mode<synchronous>, transform_indices = @transform_2, window_bounds = array<i64: 1, 128>}, {transform_indices = @transform_3, window_bounds = array<i64: 32, 128>}]} {
    %c0 = arith.constant 0 : index
    %c0_0 = arith.constant 0 : index
    %0 = vector.load %arg1[%c0, %c0_0] : memref<32x800xbf16, #tpu.memory_space<vmem>>, vector<32x800xbf16>
    %c0_1 = arith.constant 0 : index
    %c0_2 = arith.constant 0 : index
    %1 = vector.load %arg2[%c0_1, %c0_2] : memref<800x128xbf16, #tpu.memory_space<vmem>>, vector<800x128xbf16>
    %cst = arith.constant dense<0.000000e+00> : vector<32x128xf32>
    %2 = tpu.matmul %0, %1, %cst {dimension_numbers = #tpu.dot_dimension_numbers<[1], [0], [0], [1], [0, 0, 1, 1], [], []>} : vector<32x800xbf16>, vector<800x128xbf16>, vector<32x128xf32> -> vector<32x128xf32>
    %c0_3 = arith.constant 0 : index
    %c0_4 = arith.constant 0 : index
    %3 = vector.load %arg3[%c0_3, %c0_4] : memref<1x128xf32, #tpu.memory_space<vmem>>, vector<1x128xf32>
    %4 = vector.broadcast %3 : vector<1x128xf32> to vector<32x128xf32>
    %5 = arith.addf %2, %4 : vector<32x128xf32>
    %cst_5 = arith.constant 0.000000e+00 : f32
    %6 = vector.broadcast %cst_5 : f32 to vector<32x128xf32>
    %7 = arith.maximumf %5, %6 : vector<32x128xf32>
    %8 = arith.truncf %7 : vector<32x128xf32> to vector<32x128xbf16>
    %c0_6 = arith.constant 0 : index
    %c0_7 = arith.constant 0 : index
    %9 = vector.load %arg4[%c0_6, %c0_7] : memref<32x128xbf16, #tpu.memory_space<vmem>>, vector<32x128xbf16>
    tpu.vector_store %arg4[%c0_6, %c0_7], %8 {strides = array<i32>} : memref<32x128xbf16, #tpu.memory_space<vmem>>, vector<32x128xbf16>,
    return
  }
  func.func @transform_0(%arg0: i32) -> (i32, i32) {
    %c0_i32 = arith.constant 0 : i32
    %c0_i32_0 = arith.constant 0 : i32
    return %arg0, %c0_i32 : i32, i32
  }
  func.func @transform_1(%arg0: i32) -> (i32, i32) {
    %c0_i32 = arith.constant 0 : i32
    %c0_i32_0 = arith.constant 0 : i32
    %c0_i32_1 = arith.constant 0 : i32
    return %c0_i32, %c0_i32_0 : i32, i32
  }
  func.func @transform_2(%arg0: i32) -> (i32, i32) {
    %c0_i32 = arith.constant 0 : i32
    %c0_i32_0 = arith.constant 0 : i32
    %c0_i32_1 = arith.constant 0 : i32
    return %c0_i32, %c0_i32_0 : i32, i32
  }
  func.func @transform_3(%arg0: i32) -> (i32, i32) {
    %c0_i32 = arith.constant 0 : i32
    %c0_i32_0 = arith.constant 0 : i32
    return %arg0, %c0_i32 : i32, i32
  }
}

module attributes {stable_mosaic.version = 11 : i64} {
  func.func @_head_matmul_kernel(%arg0: i32, %arg1: memref<16x2048xbf16, #tpu.memory_space<vmem>>, %arg2: memref<2048x128xbf16, #tpu.memory_space<vmem>>, %arg3: memref<16x128xf32, #tpu.memory_space<vmem>>) attributes {dimension_semantics = [#tpu.dimension_semantics<parallel>], iteration_bounds = array<i64: 1>, scalar_prefetch = 0 : i64, scratch_operands = 0 : i64, tpu.core_type = #tpu.core_type<tc>, window_params = [{transform_indices = @transform_0, window_bounds = array<i64: 16, 2048>}, {pipeline_mode = #tpu.pipeline_mode<synchronous>, transform_indices = @transform_1, window_bounds = array<i64: 2048, 128>}, {transform_indices = @transform_2, window_bounds = array<i64: 16, 128>}]} {
    %c0 = arith.constant 0 : index
    %c0_0 = arith.constant 0 : index
    %0 = vector.load %arg1[%c0, %c0_0] : memref<16x2048xbf16, #tpu.memory_space<vmem>>, vector<16x2048xbf16>
    %c0_1 = arith.constant 0 : index
    %c0_2 = arith.constant 0 : index
    %1 = vector.load %arg2[%c0_1, %c0_2] : memref<2048x128xbf16, #tpu.memory_space<vmem>>, vector<2048x128xbf16>
    %cst = arith.constant dense<0.000000e+00> : vector<16x128xf32>
    %2 = tpu.matmul %0, %1, %cst {dimension_numbers = #tpu.dot_dimension_numbers<[1], [0], [0], [1], [0, 0, 1, 1], [], []>} : vector<16x2048xbf16>, vector<2048x128xbf16>, vector<16x128xf32> -> vector<16x128xf32>
    %c0_3 = arith.constant 0 : index
    %c0_4 = arith.constant 0 : index
    %3 = vector.load %arg3[%c0_3, %c0_4] : memref<16x128xf32, #tpu.memory_space<vmem>>, vector<16x128xf32>
    tpu.vector_store %arg3[%c0_3, %c0_4], %2 {strides = array<i32>} : memref<16x128xf32, #tpu.memory_space<vmem>>, vector<16x128xf32>,
    return
  }
  func.func @transform_0(%arg0: i32) -> (i32, i32) {
    %c0_i32 = arith.constant 0 : i32
    %c0_i32_0 = arith.constant 0 : i32
    return %arg0, %c0_i32 : i32, i32
  }
  func.func @transform_1(%arg0: i32) -> (i32, i32) {
    %c0_i32 = arith.constant 0 : i32
    %c0_i32_0 = arith.constant 0 : i32
    %c0_i32_1 = arith.constant 0 : i32
    return %c0_i32, %c0_i32_0 : i32, i32
  }
  func.func @transform_2(%arg0: i32) -> (i32, i32) {
    %c0_i32 = arith.constant 0 : i32
    %c0_i32_0 = arith.constant 0 : i32
    return %arg0, %c0_i32 : i32, i32
  }
}

</mosaic_0001>

<bundles_post_ra>
// kernel: discriminator_forward.4
= control target key start
LH: loop header
LB: loop body
LE: loop exit
PB: predicated region body
PF: predicated region fallthrough
CT: control target
= control target key end

     0   :  { %s495_s12 = smov 0   ;;  %s531_s0 = inlined_call_operand.vmem [shape: bf16[400,25], index: 0, kind: input, shape index: {}]   ;;  %s532_s1 = inlined_call_operand.vmem [shape: bf16[25,128], index: 1, kind: input, shape index: {}]   ;;  %s533_s2 = inlined_call_operand.vmem [shape: f32[1,128], index: 2, kind: input, shape index: {}]   ;;  %s534_s3 = inlined_call_operand.vmem [shape: bf16[400,128], index: 3, kind: output, shape index: {}]  }
   0x1 LB: > { %s372_s13 = sadd.s32 4294967295, %s472_s12   ;;  %p376_p0 = scmp.ge.s32.totalorder %s472_s12, 1  ;;  %s472_s12 = sphi %s495_s12, %s13_s12  }
   0x2   : > { %p138_p1 = scmp.lt.s32.totalorder %s472_s12, 6 }
   0x4   : > { %p139_p2 = pnand %p376_p0, %p138_p1 }
   0x5   : > { %s162_s18 = smul.u32 (!%p139_p2), 10, %s372_s13 }
   0x6   : > { %142 = sbr.rel (%p139_p2) target bundleno = 187 (0xbb), region = 32 }
   0x7   : > { %p163_p3 = scmp.lt.s32.totalorder (!%p139_p2), %s162_s18, 49 }
   0xb   : > { %v405_v0 = vld [vmem:[%s532_s1 + $0x8] sm:$0xf]  ;;  %v420_v1 = vld [vmem:[%s532_s1 + $0x8] sm:$0x10]  ;;  %vm245_vm0 = vcmask 1043456   ;;  %vm246_vm1 = vcmask 1044480  }
   0xc   : > { %v406_v2 = vor.u32 %v420_v1, %v405_v0  ;;  %v474_v3 = vmov 65535   ;;  %s536_s18 = smov (!%p163_p3, %s162_s18), 49  ;;  %v419_v7 = vld [vmem:[%s532_s1] sm:$0xff]  ;;  %vm229_vm2 = vcmask 203776  }
   0xd   : > { %v247_v4 = vsel %vm245_vm0, 4294967295, %v474_v3  ;;  %s377_s21 = sshll.u32 %s536_s18, 2  ;;  %v465_v15 = vld [vmem:[%s533_s2] ss:$0 sm:$0xff] }
   0xe   : > { %v248_v5 = vsel %vm246_vm1, %v247_v4, 0  ;;  %s166_s24 = scalar_lea.vmem %s531_s0, %s377_s21  ;;  %s172_s29 = scalar_lea.vmem %s534_s3, %s377_s21 }
   0xf   : > { %v250_v6 = vand.u32 %v406_v2, %v248_v5  ;;  %v416_v8 = vld [vmem:[%s166_s24 + $0x10] sm:$0xff]  ;;  %v418_v9 = vld [vmem:[%s166_s24 + $0x20] sm:$0xff]  ;;  %v415_v11 = vld [vmem:[%s166_s24 + $0x8] sm:$0xff] }
  0x10   : > { %v414_v10 = vld [vmem:[%s166_s24] sm:$0xff]  ;;  %v417_v12 = vld [vmem:[%s166_s24 + $0x18] sm:$0xff] }
  0x11   : > { %451 = vmatpush.bf16.msra.mxu2 %v250_v6  ;;  %452 = vmatpush.bf16.msra.mxu3 %v250_v6 }
  0x12   : > { %258 = vmatpush.bf16.msra.mxu0 %v250_v6  ;;  %450 = vmatpush.bf16.msra.mxu1 %v250_v6 }
  0x15   : > { %454 = vmatpush.bf16.msra.mxu2 %v419_v7  ;;  %455 = vmatpush.bf16.msra.mxu3 %v419_v7 }
  0x16   : > { %259 = vmatpush.bf16.msra.mxu0 %v419_v7  ;;  %453 = vmatpush.bf16.msra.mxu1 %v419_v7 }
  0x18   : > { %409 = vmatmul.msk.bf16.vlgmr.msra.gmra.mxu2 %vm229_vm2, %v416_v8  ;;  %411 = vmatmul.msk.bf16.vlgmr.msra.gmra.mxu3 %vm229_vm2, %v418_v9 }
  0x19   : > { %407 = vmatmul.msk.bf16.vlgmr.msra.gmra.mxu0 %vm229_vm2, %v414_v10  ;;  %408 = vmatmul.msk.bf16.vlgmr.msra.gmra.mxu1 %vm229_vm2, %v415_v11 }
  0x28   : > { %410 = vmatmul.msk.bf16.gmra.mxu2 %vm229_vm2, %v417_v12 }
  0x96   : > { %v261_v13 = vpop.f32.mrf.mxu0  ;;  %v266_v14 = vpop.f32.mrf.mxu1 }
  0x97   : > { %v262_v17 = vadd.f32 %v465_v15, %v261_v13  ;;  %v267_v18 = vadd.f32 %v465_v15, %v266_v14 }
  0x99   : > { %v286_v22 = vmax.f32 %v262_v17, 0.0  ;;  %v288_v23 = vmax.f32 %v267_v18, 0.0 }
  0x9b   : > { %v271_v16 = vpop.f32.mrf.mxu2  ;;  %v281_v19 = vpop.f32.mrf.mxu3 }
  0x9c   : > { %v282_v26 = vadd.f32 %v465_v15, %v281_v19  ;;  %v272_v29 = vadd.f32 %v465_v15, %v271_v16 }
  0x9e   : > { %v263_v20 = vpop.f32.mrf.mxu0  ;;  %v268_v21 = vpop.f32.mrf.mxu1  ;;  %v294_v35 = vmax.f32 %v282_v26, 0.0  ;;  %v290_v37 = vmax.f32 %v272_v29, 0.0 }
  0x9f   : > { %v264_v24 = vadd.f32 %v465_v15, %v263_v20  ;;  %v269_v25 = vadd.f32 %v465_v15, %v268_v21 }
  0xa1   : > { %v287_v27 = vmax.f32 %v264_v24, 0.0  ;;  %v289_v28 = vmax.f32 %v269_v25, 0.0 }
  0xa3   : > { %v273_v30 = vpop.f32.mrf.mxu2  ;;  %v424_v31 = vpack.c.bf16 %v287_v27, %v286_v22  ;;  %v429_v32 = vpack.c.bf16 %v289_v28, %v288_v23  ;;  %v283_v33 = vpop.f32.mrf.mxu3 }
  0xa4   : > { %v274_v34 = vadd.f32 %v465_v15, %v273_v30  ;;  %v284_v36 = vadd.f32 %v465_v15, %v283_v33 }
  0xa5   : > { %425 = vst [vmem:[%s172_s29] sm:$0xff] %v424_v31  }
  0xa6   : > { %v291_v38 = vmax.f32 %v274_v34, 0.0  ;;  %446 = vst [vmem:[%s172_s29 + $0x8] sm:$0xff] %v429_v32   ;;  %v295_v39 = vmax.f32 %v284_v36, 0.0 }
  0xa8   : > { %v434_v40 = vpack.c.bf16 %v291_v38, %v290_v37  ;;  %v444_v41 = vpack.c.bf16 %v295_v39, %v294_v35 }
  0xaa   : > { %447 = vst [vmem:[%s172_s29 + $0x10] sm:$0xff] %v434_v40  }
  0xab   : > { %v276_v42 = vpop.f32.mrf.mxu2  ;;  %449 = vst [vmem:[%s172_s29 + $0x20] sm:$0xff] %v444_v41  }
  0xac   : > { %v277_v43 = vadd.f32 %v465_v15, %v276_v42 }
  0xae   : > { %v292_v46 = vmax.f32 %v277_v43, 0.0 }
  0xb3   : > { %v278_v44 = vpop.f32.mrf.mxu2 }
  0xb4   : > { %v279_v45 = vadd.f32 %v465_v15, %v278_v44 }
  0xb6   : > { %v293_v47 = vmax.f32 %v279_v45, 0.0 }
  0xb8   : > { %v439_v48 = vpack.c.bf16 %v293_v47, %v292_v46 }
  0xba   : > { %448 = vst [vmem:[%s172_s29 + $0x18] sm:$0xff] %v439_v48  }
  0xbb PF: > { %s13_s12 = sadd.s32 1, %s472_s12  }
  0xbc   : > { %p10_p4 = scmp.ge.s32.totalorder %s13_s12, 7  }
  0xbe   :  { %12 = sbr.rel (!%p10_p4) target bundleno = 1 (0x1), region = 62 }

// kernel: discriminator_forward.5
= control target key start
LH: loop header
LB: loop body
LE: loop exit
PB: predicated region body
PF: predicated region fallthrough
CT: control target
= control target key end

     0   :  { %vm380_vm0 = vcmask 130048   ;;  %s1248_s1 = inlined_call_operand.vmem [shape: bf16[400,128], index: 1, kind: input, shape index: {}]   ;;  %s1249_s0 = inlined_call_operand.vmem [shape: bf16[112,400], index: 0, kind: input, shape index: {}]   ;;  %s1250_s2 = inlined_call_operand.vmem [shape: f32[1,128], index: 2, kind: input, shape index: {}]   ;;  %s1251_s3 = inlined_call_operand.vmem [shape: bf16[112,128], index: 3, kind: output, shape index: {}]  }
   0x1   :  { %v878_v0 = vld [vmem:[%s1248_s1 + $0x38] sm:$0xff]  ;;  %v877_v3 = vld [vmem:[%s1248_s1 + $0x30] sm:$0xff]  ;;  %v876_v6 = vld [vmem:[%s1248_s1 + $0x28] sm:$0xff] }
   0x2   :  { %v886_v1 = vld [vmem:[%s1248_s1 + $0x78] sm:$0xff]  ;;  %402 = vmatpush.bf16.msra.mxu0 %v878_v0  ;;  %v885_v4 = vld [vmem:[%s1248_s1 + $0x70] sm:$0xff]  ;;  %v884_v7 = vld [vmem:[%s1248_s1 + $0x68] sm:$0xff] }
   0x3   :  { %v894_v2 = vld [vmem:[%s1248_s1 + $0xb8] sm:$0xff]  ;;  %446 = vmatpush.bf16.msra.mxu1 %v886_v1  ;;  %v893_v5 = vld [vmem:[%s1248_s1 + $0xb0] sm:$0xff]  ;;  %v895_v8 = vld [vmem:[%s1248_s1 + $0xc0] sm:$0xff] }
   0x4   :  { %490 = vmatpush.bf16.msra.mxu2 %v894_v2  ;;  %v892_v9 = vld [vmem:[%s1248_s1 + $0xa8] sm:$0xff]  ;;  %v636_v11 = vld [vmem:[%s1249_s0 + $0x18] sm:$0xf0]  ;;  %541 = vmatpush.bf16.msra.mxu3 %v895_v8  ;;  %v875_v13 = vld [vmem:[%s1248_s1 + $0x20] sm:$0xff] }
   0x5   :  { %v844_v10 = vld [vmem:[%s1249_s0 + $0xc] sm:$0xf]  ;;  %v883_v14 = vld [vmem:[%s1248_s1 + $0x60] sm:$0xff]  ;;  %v874_v16 = vld [vmem:[%s1248_s1 + $0x18] sm:$0xff] }
   0x6   :  { %403 = vmatpush.bf16.msra.mxu0 %v877_v3  ;;  %v639_v12 = vor.u32 %v844_v10, %v636_v11  ;;  %v891_v15 = vld [vmem:[%s1248_s1 + $0xa0] sm:$0xff]  ;;  %v882_v17 = vld [vmem:[%s1248_s1 + $0x58] sm:$0xff]  ;;  %v873_v19 = vld [vmem:[%s1248_s1 + $0x10] sm:$0xff] }
   0x7   :  { %447 = vmatpush.bf16.msra.mxu1 %v885_v4  ;;  %v890_v18 = vld [vmem:[%s1248_s1 + $0x98] sm:$0xff]  ;;  %v881_v20 = vld [vmem:[%s1248_s1 + $0x50] sm:$0xff]  ;;  %v848_v22 = vld [vmem:[%s1249_s0 + $0x2c] sm:$0xf] }
   0x8   :  { %491 = vmatpush.bf16.msra.mxu2 %v893_v5  ;;  %836 = vmatmul.msk.bf16.vlgmr.msra.gmra.mxu3 %vm380_vm0, %v639_v12  ;;  %v889_v21 = vld [vmem:[%s1248_s1 + $0x90] sm:$0xff]  ;;  %v652_v23 = vld [vmem:[%s1249_s0 + $0x38] sm:$0xf0]  ;;  %v872_v24 = vld [vmem:[%s1248_s1 + $0x8] sm:$0xff] }
   0x9   :  { %v880_v25 = vld [vmem:[%s1248_s1 + $0x48] sm:$0xff]  ;;  %v655_v27 = vor.u32 %v848_v22, %v652_v23  ;;  %v871_v28 = vld [vmem:[%s1248_s1] sm:$0xff]  ;;  %v845_v31 = vld [vmem:[%s1249_s0 + $0xc] sm:$0xf0] }
   0xa   :  { %404 = vmatpush.bf16.msra.mxu0 %v876_v6  ;;  %v888_v26 = vld [vmem:[%s1248_s1 + $0x88] sm:$0xff]  ;;  %v879_v29 = vld [vmem:[%s1248_s1 + $0x40] sm:$0xff]  ;;  %v628_v33 = vld [vmem:[%s1249_s0 + $0x10] sm:$0xf0] }
   0xb   :  { %448 = vmatpush.bf16.msra.mxu1 %v884_v7  ;;  %v626_v30 = vld [vmem:[%s1249_s0] sm:$0xf]  ;;  %v843_v32 = vld [vmem:[%s1249_s0 + $0x4] sm:$0xf]  ;;  %v634_v35 = vld [vmem:[%s1249_s0 + $0x8] sm:$0xf] }
   0xc   :  { %492 = vmatpush.bf16.msra.mxu2 %v892_v9  ;;  %v887_v34 = vld [vmem:[%s1248_s1 + $0x80] sm:$0xff]  ;;  %v846_v36 = vld [vmem:[%s1249_s0 + $0x14] sm:$0xf0]  ;;  %v627_v37 = vor.u32 %v845_v31, %v626_v30  ;;  %v631_v38 = vor.u32 %v843_v32, %v628_v33  ;;  %v852_v40 = vld [vmem:[%s1249_s0 + $0x4c] sm:$0xf] }
   0xd   :  { %v635_v39 = vor.u32 %v846_v36, %v634_v35  ;;  %v668_v41 = vld [vmem:[%s1249_s0 + $0x58] sm:$0xf0]  ;;  %v642_v43 = vld [vmem:[%s1249_s0 + $0x20] sm:$0xf]  ;;  %v849_v44 = vld [vmem:[%s1249_s0 + $0x2c] sm:$0xf0] }
   0xe   :  { %405 = vmatpush.bf16.msra.mxu0 %v875_v13  ;;  %v671_v42 = vor.u32 %v852_v40, %v668_v41  ;;  %v847_v45 = vld [vmem:[%s1249_s0 + $0x24] sm:$0xf]  ;;  %v644_v46 = vld [vmem:[%s1249_s0 + $0x30] sm:$0xf0]  ;;  %v650_v47 = vld [vmem:[%s1249_s0 + $0x28] sm:$0xf]  ;;  %v643_v49 = vor.u32 %v849_v44, %v642_v43 }
   0xf   :  { %449 = vmatpush.bf16.msra.mxu1 %v883_v14  ;;  %v850_v48 = vld [vmem:[%s1249_s0 + $0x34] sm:$0xf0]  ;;  %v647_v50 = vor.u32 %v847_v45, %v644_v46  ;;  %v856_v52 = vld [vmem:[%s1249_s0 + $0x6c] sm:$0xf]  ;;  %v684_v53 = vld [vmem:[%s1249_s0 + $0x78] sm:$0xf0] }
  0x10   :  { %493 = vmatpush.bf16.msra.mxu2 %v891_v15  ;;  %v651_v51 = vor.u32 %v850_v48, %v650_v47  ;;  %v687_v54 = vor.u32 %v856_v52, %v684_v53  ;;  %v658_v55 = vld [vmem:[%s1249_s0 + $0x40] sm:$0xf]  ;;  %v853_v56 = vld [vmem:[%s1249_s0 + $0x4c] sm:$0xf0]  ;;  %v851_v57 = vld [vmem:[%s1249_s0 + $0x44] sm:$0xf] }
  0x11   :  { %v660_v58 = vld [vmem:[%s1249_s0 + $0x50] sm:$0xf0]  ;;  %v666_v59 = vld [vmem:[%s1249_s0 + $0x48] sm:$0xf]  ;;  %v854_v60 = vld [vmem:[%s1249_s0 + $0x54] sm:$0xf0]  ;;  %v659_v61 = vor.u32 %v853_v56, %v658_v55 }
  0x12   :  { %406 = vmatpush.bf16.msra.mxu0 %v874_v16  ;;  %v663_v62 = vor.u32 %v851_v57, %v660_v58  ;;  %v667_v63 = vor.u32 %v854_v60, %v666_v59  ;;  %v860_v0 = vld [vmem:[%s1249_s0 + $0x8c] sm:$0xf]  ;;  %v700_v1 = vld [vmem:[%s1249_s0 + $0x98] sm:$0xf0]  ;;  %v674_v3 = vld [vmem:[%s1249_s0 + $0x60] sm:$0xf] }
  0x13   :  { %450 = vmatpush.bf16.msra.mxu1 %v882_v17  ;;  %v703_v2 = vor.u32 %v860_v0, %v700_v1  ;;  %v857_v4 = vld [vmem:[%s1249_s0 + $0x6c] sm:$0xf0]  ;;  %v855_v5 = vld [vmem:[%s1249_s0 + $0x64] sm:$0xf]  ;;  %v676_v6 = vld [vmem:[%s1249_s0 + $0x70] sm:$0xf0] }
  0x14   :  { %494 = vmatpush.bf16.msra.mxu2 %v890_v18  ;;  %v682_v7 = vld [vmem:[%s1249_s0 + $0x68] sm:$0xf]  ;;  %v858_v8 = vld [vmem:[%s1249_s0 + $0x74] sm:$0xf0]  ;;  %v675_v9 = vor.u32 %v857_v4, %v674_v3  ;;  %v679_v10 = vor.u32 %v855_v5, %v676_v6  ;;  %v864_v12 = vld [vmem:[%s1249_s0 + $0xac] sm:$0xf] }
  0x15   :  { %v683_v11 = vor.u32 %v858_v8, %v682_v7  ;;  %v716_v13 = vld [vmem:[%s1249_s0 + $0xb8] sm:$0xf0]  ;;  %v690_v15 = vld [vmem:[%s1249_s0 + $0x80] sm:$0xf]  ;;  %v861_v16 = vld [vmem:[%s1249_s0 + $0x8c] sm:$0xf0] }
  0x16   :  { %407 = vmatpush.bf16.msra.mxu0 %v873_v19  ;;  %v719_v14 = vor.u32 %v864_v12, %v716_v13  ;;  %v859_v17 = vld [vmem:[%s1249_s0 + $0x84] sm:$0xf]  ;;  %v692_v18 = vld [vmem:[%s1249_s0 + $0x90] sm:$0xf0]  ;;  %v698_v19 = vld [vmem:[%s1249_s0 + $0x88] sm:$0xf] }
  0x17   :  { %451 = vmatpush.bf16.msra.mxu1 %v881_v20  ;;  %v862_v20 = vld [vmem:[%s1249_s0 + $0x94] sm:$0xf0]  ;;  %v695_v22 = vor.u32 %v859_v17, %v692_v18  ;;  %v708_v30 = vld [vmem:[%s1249_s0 + $0xb0] sm:$0xf0]  ;;  %v714_v31 = vld [vmem:[%s1249_s0 + $0xa8] sm:$0xf] }
  0x18   :  { %495 = vmatpush.bf16.msra.mxu2 %v889_v21  ;;  %837 = vmatmul.msk.bf16.gmra.mxu3 %vm380_vm0, %v655_v27  ;;  %v691_v21 = vor.u32 %v861_v16, %v690_v15  ;;  %v699_v23 = vor.u32 %v862_v20, %v698_v19  ;;  %v706_v27 = vld [vmem:[%s1249_s0 + $0xa0] sm:$0xf]  ;;  %v866_v32 = vld [vmem:[%s1249_s0 + $0xb4] sm:$0xf0]  ;;  %v730_v40 = vld [vmem:[%s1249_s0 + $0xc8] sm:$0xf] }
  0x19   :  { %v715_v35 = vor.u32 %v866_v32, %v714_v31  ;;  %v722_v36 = vld [vmem:[%s1249_s0 + $0xc0] sm:$0xf]  ;;  %v870_v41 = vld [vmem:[%s1249_s0 + $0xd4] sm:$0xf0] }
  0x1a   :  { %408 = vmatpush.bf16.msra.mxu0 %v872_v24  ;;  %v868_v24 = vld [vmem:[%s1249_s0 + $0xcc] sm:$0xf]  ;;  %v731_v44 = vor.u32 %v870_v41, %v730_v40  ;;  %v1211_v47 = vld [vmem:[%s1250_s2] ss:$0 sm:$0xff] }
  0x1b   :  { %452 = vmatpush.bf16.msra.mxu1 %v880_v25  ;;  %v732_v25 = vld [vmem:[%s1249_s0 + $0xd8] sm:$0xf0] }
  0x1c   :  { %496 = vmatpush.bf16.msra.mxu2 %v888_v26  ;;  %v735_v26 = vor.u32 %v868_v24, %v732_v25 }
  0x1e   :  { %409 = vmatpush.bf16.msra.mxu0 %v871_v28  ;;  %v865_v28 = vld [vmem:[%s1249_s0 + $0xac] sm:$0xf0] }
  0x1f   :  { %453 = vmatpush.bf16.msra.mxu1 %v879_v29  ;;  %v863_v29 = vld [vmem:[%s1249_s0 + $0xa4] sm:$0xf]  ;;  %v707_v33 = vor.u32 %v865_v28, %v706_v27 }
  0x20   :  { %497 = vmatpush.bf16.msra.mxu2 %v887_v34  ;;  %v711_v34 = vor.u32 %v863_v29, %v708_v30 }
  0x21   :  { %410 = vmatmul.bf16.vlgmr.msra.gmra.mxu0 %v627_v37  ;;  %v869_v37 = vld [vmem:[%s1249_s0 + $0xcc] sm:$0xf0] }
  0x22   :  { %454 = vmatmul.bf16.vlgmr.msra.gmra.mxu1 %v631_v38  ;;  %v867_v38 = vld [vmem:[%s1249_s0 + $0xc4] sm:$0xf] }
  0x23   :  { %498 = vmatmul.bf16.vlgmr.msra.gmra.mxu2 %v635_v39  ;;  %v724_v39 = vld [vmem:[%s1249_s0 + $0xd0] sm:$0xf0] }
  0x24   :  { %v727_v43 = vor.u32 %v867_v38, %v724_v39 }
  0x28   :  { %838 = vmatmul.msk.bf16.gmra.mxu3 %vm380_vm0, %v671_v42  ;;  %v723_v42 = vor.u32 %v869_v37, %v722_v36 }
  0x31   :  { %415 = vmatmul.bf16.gmra.mxu0 %v643_v49 }
  0x32   :  { %459 = vmatmul.bf16.gmra.mxu1 %v647_v50 }
  0x33   :  { %503 = vmatmul.bf16.gmra.mxu2 %v651_v51 }
  0x38   :  { %839 = vmatmul.msk.bf16.gmra.mxu3 %vm380_vm0, %v687_v54 }
  0x41   :  { %420 = vmatmul.bf16.gmra.mxu0 %v659_v61 }
  0x42   :  { %464 = vmatmul.bf16.gmra.mxu1 %v663_v62 }
  0x43   :  { %508 = vmatmul.bf16.gmra.mxu2 %v667_v63 }
  0x48   :  { %840 = vmatmul.msk.bf16.gmra.mxu3 %vm380_vm0, %v703_v2 }
  0x51   :  { %425 = vmatmul.bf16.gmra.mxu0 %v675_v9 }
  0x52   :  { %469 = vmatmul.bf16.gmra.mxu1 %v679_v10 }
  0x53   :  { %513 = vmatmul.bf16.gmra.mxu2 %v683_v11 }
  0x58   :  { %841 = vmatmul.msk.bf16.gmra.mxu3 %vm380_vm0, %v719_v14 }
  0x61   :  { %430 = vmatmul.bf16.gmra.mxu0 %v691_v21 }
  0x62   :  { %474 = vmatmul.bf16.gmra.mxu1 %v695_v22 }
  0x63   :  { %518 = vmatmul.bf16.gmra.mxu2 %v699_v23 }
  0x68   :  { %842 = vmatmul.msk.bf16.gmra.mxu3 %vm380_vm0, %v735_v26 }
  0x71   :  { %435 = vmatmul.bf16.gmra.mxu0 %v707_v33 }
  0x72   :  { %479 = vmatmul.bf16.gmra.mxu1 %v711_v34 }
  0x73   :  { %523 = vmatmul.bf16.gmra.mxu2 %v715_v35 }
  0x81   :  { %440 = vmatmul.bf16.gmra.mxu0 %v723_v42 }
  0x82   :  { %484 = vmatmul.bf16.gmra.mxu1 %v727_v43 }
  0x83   :  { %528 = vmatmul.bf16.gmra.mxu2 %v731_v44 }
  0x8b   :  { %v543_v45 = vpop.f32.mrf.mxu3 }
  0x93   :  { %v545_v46 = vpop.f32.mrf.mxu3 }
  0x9b   :  { %v548_v50 = vpop.f32.mrf.mxu3 }
  0x9e   :  { %v411_v48 = vpop.f32.mrf.mxu0 }
  0x9f   :  { %v455_v49 = vpop.f32.mrf.mxu1  ;;  %v412_v51 = vadd.f32 %v1211_v47, %v411_v48 }
  0xa1   :  { %v456_v53 = vadd.f32 %v455_v49, %v412_v51 }
  0xa3   :  { %v550_v58 = vpop.f32.mrf.mxu3 }
  0xa6   :  { %v499_v52 = vpop.f32.mrf.mxu2  ;;  %v413_v54 = vpop.f32.mrf.mxu0 }
  0xa7   :  { %v457_v55 = vpop.f32.mrf.mxu1  ;;  %v414_v56 = vadd.f32 %v1211_v47, %v413_v54  ;;  %v500_v57 = vadd.f32 %v499_v52, %v456_v53 }
  0xa9   :  { %v458_v59 = vadd.f32 %v457_v55, %v414_v56  ;;  %v544_v61 = vadd.f32 %v543_v45, %v500_v57 }
  0xab   :  { %v578_v2 = vmax.f32 %v544_v61, 0.0  ;;  %v553_v7 = vpop.f32.mrf.mxu3 }
  0xae   :  { %v501_v60 = vpop.f32.mrf.mxu2  ;;  %v416_v63 = vpop.f32.mrf.mxu0 }
  0xaf   :  { %v502_v62 = vadd.f32 %v501_v60, %v458_v59  ;;  %v460_v0 = vpop.f32.mrf.mxu1  ;;  %v417_v4 = vadd.f32 %v1211_v47, %v416_v63 }
  0xb1   :  { %v546_v1 = vadd.f32 %v545_v46, %v502_v62  ;;  %v461_v8 = vadd.f32 %v460_v0, %v417_v4 }
  0xb3   :  { %v579_v3 = vmax.f32 %v546_v1, 0.0  ;;  %v555_v19 = vpop.f32.mrf.mxu3 }
  0xb5   :  { %v899_v5 = vpack.c.bf16 %v579_v3, %v578_v2 }
  0xb6   :  { %v504_v6 = vpop.f32.mrf.mxu2  ;;  %v418_v9 = vpop.f32.mrf.mxu0 }
  0xb7   :  { %900 = vst [vmem:[%s1251_s3] sm:$0xff] %v899_v5   ;;  %v462_v10 = vpop.f32.mrf.mxu1  ;;  %v419_v11 = vadd.f32 %v1211_v47, %v418_v9  ;;  %v505_v12 = vadd.f32 %v504_v6, %v461_v8 }
  0xb9   :  { %v463_v13 = vadd.f32 %v462_v10, %v419_v11  ;;  %v549_v15 = vadd.f32 %v548_v50, %v505_v12 }
  0xbb   :  { %v580_v21 = vmax.f32 %v549_v15, 0.0  ;;  %v558_v30 = vpop.f32.mrf.mxu3 }
  0xbe   :  { %v506_v14 = vpop.f32.mrf.mxu2  ;;  %v421_v17 = vpop.f32.mrf.mxu0 }
  0xbf   :  { %v507_v16 = vadd.f32 %v506_v14, %v463_v13  ;;  %v465_v18 = vpop.f32.mrf.mxu1  ;;  %v422_v23 = vadd.f32 %v1211_v47, %v421_v17 }
  0xc1   :  { %v551_v20 = vadd.f32 %v550_v58, %v507_v16  ;;  %v466_v26 = vadd.f32 %v465_v18, %v422_v23 }
  0xc3   :  { %v581_v22 = vmax.f32 %v551_v20, 0.0  ;;  %v560_v42 = vpop.f32.mrf.mxu3 }
  0xc5   :  { %v904_v24 = vpack.c.bf16 %v581_v22, %v580_v21 }
  0xc6   :  { %v509_v25 = vpop.f32.mrf.mxu2  ;;  %v423_v27 = vpop.f32.mrf.mxu0 }
  0xc7   :  { %931 = vst [vmem:[%s1251_s3 + $0x8] sm:$0xff] %v904_v24   ;;  %v467_v28 = vpop.f32.mrf.mxu1  ;;  %v424_v29 = vadd.f32 %v1211_v47, %v423_v27  ;;  %v510_v31 = vadd.f32 %v509_v25, %v466_v26 }
  0xc9   :  { %v468_v32 = vadd.f32 %v467_v28, %v424_v29  ;;  %v554_v34 = vadd.f32 %v553_v7, %v510_v31 }
  0xcb   :  { %v582_v39 = vmax.f32 %v554_v34, 0.0  ;;  %v563_v53 = vpop.f32.mrf.mxu3 }
  0xce   :  { %v511_v33 = vpop.f32.mrf.mxu2  ;;  %v426_v36 = vpop.f32.mrf.mxu0 }
  0xcf   :  { %v512_v35 = vadd.f32 %v511_v33, %v468_v32  ;;  %v470_v37 = vpop.f32.mrf.mxu1  ;;  %v427_v41 = vadd.f32 %v1211_v47, %v426_v36 }
  0xd1   :  { %v556_v38 = vadd.f32 %v555_v19, %v512_v35  ;;  %v471_v45 = vadd.f32 %v470_v37, %v427_v41 }
  0xd3   :  { %v583_v40 = vmax.f32 %v556_v38, 0.0  ;;  %v565_v3 = vpop.f32.mrf.mxu3 }
  0xd5   :  { %v909_v43 = vpack.c.bf16 %v583_v40, %v582_v39 }
  0xd6   :  { %v514_v44 = vpop.f32.mrf.mxu2  ;;  %v428_v46 = vpop.f32.mrf.mxu0 }
  0xd7   :  { %932 = vst [vmem:[%s1251_s3 + $0x10] sm:$0xff] %v909_v43   ;;  %v472_v48 = vpop.f32.mrf.mxu1  ;;  %v429_v49 = vadd.f32 %v1211_v47, %v428_v46  ;;  %v515_v50 = vadd.f32 %v514_v44, %v471_v45 }
  0xd9   :  { %v473_v51 = vadd.f32 %v472_v48, %v429_v49  ;;  %v559_v54 = vadd.f32 %v558_v30, %v515_v50 }
  0xdb   :  { %v584_v59 = vmax.f32 %v559_v54, 0.0  ;;  %v568_v13 = vpop.f32.mrf.mxu3 }
  0xde   :  { %v516_v52 = vpop.f32.mrf.mxu2  ;;  %v431_v56 = vpop.f32.mrf.mxu0 }
  0xdf   :  { %v517_v55 = vadd.f32 %v516_v52, %v473_v51  ;;  %v475_v57 = vpop.f32.mrf.mxu1  ;;  %v432_v61 = vadd.f32 %v1211_v47, %v431_v56 }
  0xe1   :  { %v561_v58 = vadd.f32 %v560_v42, %v517_v55  ;;  %v476_v0 = vadd.f32 %v475_v57, %v432_v61 }
  0xe3   :  { %v585_v60 = vmax.f32 %v561_v58, 0.0  ;;  %v570_v24 = vpop.f32.mrf.mxu3 }
  0xe5   :  { %v914_v62 = vpack.c.bf16 %v585_v60, %v584_v59 }
  0xe6   :  { %v519_v63 = vpop.f32.mrf.mxu2  ;;  %v433_v1 = vpop.f32.mrf.mxu0 }
  0xe7   :  { %933 = vst [vmem:[%s1251_s3 + $0x18] sm:$0xff] %v914_v62   ;;  %v477_v2 = vpop.f32.mrf.mxu1  ;;  %v434_v4 = vadd.f32 %v1211_v47, %v433_v1  ;;  %v520_v5 = vadd.f32 %v519_v63, %v476_v0 }
  0xe9   :  { %v478_v6 = vadd.f32 %v477_v2, %v434_v4  ;;  %v564_v8 = vadd.f32 %v563_v53, %v520_v5 }
  0xeb   :  { %v586_v14 = vmax.f32 %v564_v8, 0.0  ;;  %v573_v36 = vpop.f32.mrf.mxu3 }
  0xee   :  { %v521_v7 = vpop.f32.mrf.mxu2  ;;  %v436_v10 = vpop.f32.mrf.mxu0 }
  0xef   :  { %v522_v9 = vadd.f32 %v521_v7, %v478_v6  ;;  %v480_v11 = vpop.f32.mrf.mxu1  ;;  %v437_v16 = vadd.f32 %v1211_v47, %v436_v10 }
  0xf1   :  { %v566_v12 = vadd.f32 %v565_v3, %v522_v9  ;;  %v481_v19 = vadd.f32 %v480_v11, %v437_v16 }
  0xf3   :  { %v587_v15 = vmax.f32 %v566_v12, 0.0  ;;  %v575_v48 = vpop.f32.mrf.mxu3 }
  0xf5   :  { %v919_v17 = vpack.c.bf16 %v587_v15, %v586_v14 }
  0xf6   :  { %v524_v18 = vpop.f32.mrf.mxu2  ;;  %v438_v20 = vpop.f32.mrf.mxu0 }
  0xf7   :  { %934 = vst [vmem:[%s1251_s3 + $0x20] sm:$0xff] %v919_v17   ;;  %v482_v21 = vpop.f32.mrf.mxu1  ;;  %v439_v22 = vadd.f32 %v1211_v47, %v438_v20  ;;  %v525_v23 = vadd.f32 %v524_v18, %v481_v19 }
  0xf9   :  { %v483_v25 = vadd.f32 %v482_v21, %v439_v22  ;;  %v569_v27 = vadd.f32 %v568_v13, %v525_v23 }
  0xfb   :  { %v588_v32 = vmax.f32 %v569_v27, 0.0 }
  0xfe   :  { %v526_v26 = vpop.f32.mrf.mxu2  ;;  %v441_v29 = vpop.f32.mrf.mxu0 }
  0xff   :  { %v527_v28 = vadd.f32 %v526_v26, %v483_v25  ;;  %v485_v31 = vpop.f32.mrf.mxu1  ;;  %v442_v34 = vadd.f32 %v1211_v47, %v441_v29 }
 0x101   :  { %v571_v30 = vadd.f32 %v570_v24, %v527_v28  ;;  %v486_v38 = vadd.f32 %v485_v31, %v442_v34 }
 0x103   :  { %v589_v33 = vmax.f32 %v571_v30, 0.0 }
 0x105   :  { %v924_v35 = vpack.c.bf16 %v589_v33, %v588_v32 }
 0x106   :  { %v529_v37 = vpop.f32.mrf.mxu2  ;;  %v443_v39 = vpop.f32.mrf.mxu0 }
 0x107   :  { %935 = vst [vmem:[%s1251_s3 + $0x28] sm:$0xff] %v924_v35   ;;  %v444_v40 = vadd.f32 %v1211_v47, %v443_v39  ;;  %v530_v41 = vadd.f32 %v529_v37, %v486_v38  ;;  %v487_v42 = vpop.f32.mrf.mxu1 }
 0x109   :  { %v488_v43 = vadd.f32 %v487_v42, %v444_v40  ;;  %v574_v45 = vadd.f32 %v573_v36, %v530_v41 }
 0x10b   :  { %v590_v50 = vmax.f32 %v574_v45, 0.0 }
 0x10e   :  { %v531_v44 = vpop.f32.mrf.mxu2 }
 0x10f   :  { %v532_v46 = vadd.f32 %v531_v44, %v488_v43 }
 0x111   :  { %v576_v49 = vadd.f32 %v575_v48, %v532_v46 }
 0x113   :  { %v591_v51 = vmax.f32 %v576_v49, 0.0 }
 0x115   :  { %v929_v52 = vpack.c.bf16 %v591_v51, %v590_v50 }
 0x117   :  { %936 = vst [vmem:[%s1251_s3 + $0x30] sm:$0xff] %v929_v52  }

// kernel: discriminator_forward.6
= control target key start
LH: loop header
LB: loop body
LE: loop exit
PB: predicated region body
PF: predicated region fallthrough
CT: control target
= control target key end

     0   :  { %vm505_vm0 = vcmask 261120   ;;  %s1266_s1 = inlined_call_operand.vmem [shape: bf16[800,128], index: 1, kind: input, shape index: {}]   ;;  %s1267_s2 = inlined_call_operand.vmem [shape: f32[1,128], index: 2, kind: input, shape index: {}]   ;;  %s1268_s0 = inlined_call_operand.vmem [shape: bf16[32,800], index: 0, kind: input, shape index: {}]   ;;  %s1269_s3 = inlined_call_operand.vmem [shape: bf16[32,128], index: 3, kind: output, shape index: {}]  }
   0x1   :  { %v940_v0 = vld [vmem:[%s1266_s1 + $0x38] sm:$0xff]  ;;  %v939_v4 = vld [vmem:[%s1266_s1 + $0x30] sm:$0xff]  ;;  %v938_v8 = vld [vmem:[%s1266_s1 + $0x28] sm:$0xff] }
   0x2   :  { %v948_v1 = vld [vmem:[%s1266_s1 + $0x78] sm:$0xff]  ;;  %512 = vmatpush.bf16.msra.mxu0 %v940_v0  ;;  %v947_v5 = vld [vmem:[%s1266_s1 + $0x70] sm:$0xff]  ;;  %v946_v9 = vld [vmem:[%s1266_s1 + $0x68] sm:$0xff] }
   0x3   :  { %v956_v2 = vld [vmem:[%s1266_s1 + $0xb8] sm:$0xff]  ;;  %531 = vmatpush.bf16.msra.mxu1 %v948_v1  ;;  %v955_v6 = vld [vmem:[%s1266_s1 + $0xb0] sm:$0xff]  ;;  %v954_v10 = vld [vmem:[%s1266_s1 + $0xa8] sm:$0xff] }
   0x4   :  { %v964_v3 = vld [vmem:[%s1266_s1 + $0xf8] sm:$0xff]  ;;  %550 = vmatpush.bf16.msra.mxu2 %v956_v2  ;;  %v963_v7 = vld [vmem:[%s1266_s1 + $0xf0] sm:$0xff]  ;;  %v962_v11 = vld [vmem:[%s1266_s1 + $0xe8] sm:$0xff] }
   0x5   :  { %569 = vmatpush.bf16.msra.mxu3 %v964_v3  ;;  %v937_v12 = vld [vmem:[%s1266_s1 + $0x20] sm:$0xff]  ;;  %v936_v16 = vld [vmem:[%s1266_s1 + $0x18] sm:$0xff]  ;;  %v935_v20 = vld [vmem:[%s1266_s1 + $0x10] sm:$0xff] }
   0x6   :  { %513 = vmatpush.bf16.msra.mxu0 %v939_v4  ;;  %v945_v13 = vld [vmem:[%s1266_s1 + $0x60] sm:$0xff]  ;;  %v944_v17 = vld [vmem:[%s1266_s1 + $0x58] sm:$0xff]  ;;  %v943_v21 = vld [vmem:[%s1266_s1 + $0x50] sm:$0xff] }
   0x7   :  { %532 = vmatpush.bf16.msra.mxu1 %v947_v5  ;;  %v953_v14 = vld [vmem:[%s1266_s1 + $0xa0] sm:$0xff]  ;;  %v952_v18 = vld [vmem:[%s1266_s1 + $0x98] sm:$0xff]  ;;  %v951_v22 = vld [vmem:[%s1266_s1 + $0x90] sm:$0xff] }
   0x8   :  { %551 = vmatpush.bf16.msra.mxu2 %v955_v6  ;;  %v961_v15 = vld [vmem:[%s1266_s1 + $0xe0] sm:$0xff]  ;;  %v960_v19 = vld [vmem:[%s1266_s1 + $0xd8] sm:$0xff]  ;;  %v959_v23 = vld [vmem:[%s1266_s1 + $0xd0] sm:$0xff] }
   0x9   :  { %570 = vmatpush.bf16.msra.mxu3 %v963_v7  ;;  %v934_v24 = vld [vmem:[%s1266_s1 + $0x8] sm:$0xff]  ;;  %v933_v28 = vld [vmem:[%s1266_s1] sm:$0xff]  ;;  %v922_v33 = vld [vmem:[%s1268_s0 + $0x18] sm:$0xf0] }
   0xa   :  { %514 = vmatpush.bf16.msra.mxu0 %v938_v8  ;;  %v942_v25 = vld [vmem:[%s1266_s1 + $0x48] sm:$0xff]  ;;  %v941_v29 = vld [vmem:[%s1266_s1 + $0x40] sm:$0xff]  ;;  %v972_v41 = vld [vmem:[%s1266_s1 + $0x138] sm:$0xff] }
   0xb   :  { %533 = vmatpush.bf16.msra.mxu1 %v946_v9  ;;  %v950_v26 = vld [vmem:[%s1266_s1 + $0x88] sm:$0xff]  ;;  %v949_v30 = vld [vmem:[%s1266_s1 + $0x80] sm:$0xff]  ;;  %v980_v46 = vld [vmem:[%s1266_s1 + $0x178] sm:$0xff] }
   0xc   :  { %552 = vmatpush.bf16.msra.mxu2 %v954_v10  ;;  %v958_v27 = vld [vmem:[%s1266_s1 + $0xc8] sm:$0xff]  ;;  %v957_v31 = vld [vmem:[%s1266_s1 + $0xc0] sm:$0xff]  ;;  %v971_v47 = vld [vmem:[%s1266_s1 + $0x130] sm:$0xff] }
   0xd   :  { %571 = vmatpush.bf16.msra.mxu3 %v962_v11  ;;  %v663_v32 = vld [vmem:[%s1268_s0] sm:$0xf]  ;;  %v919_v34 = vld [vmem:[%s1268_s0 + $0x4] sm:$0xf]  ;;  %v671_v36 = vld [vmem:[%s1268_s0 + $0x8] sm:$0xf] }
   0xe   :  { %515 = vmatpush.bf16.msra.mxu0 %v937_v12  ;;  %v665_v35 = vld [vmem:[%s1268_s0 + $0x1c] sm:$0xf0]  ;;  %v923_v37 = vld [vmem:[%s1268_s0 + $0x20] sm:$0xf0]  ;;  %v920_v38 = vld [vmem:[%s1268_s0 + $0xc] sm:$0xf]  ;;  %v664_v42 = vor.u32 %v922_v33, %v663_v32 }
   0xf   :  { %534 = vmatpush.bf16.msra.mxu1 %v945_v13  ;;  %v673_v39 = vld [vmem:[%s1268_s0 + $0x24] sm:$0xf0]  ;;  %v668_v43 = vor.u32 %v919_v34, %v665_v35  ;;  %v672_v44 = vor.u32 %v923_v37, %v671_v36  ;;  %v981_v48 = vld [vmem:[%s1266_s1 + $0x180] sm:$0xff]  ;;  %v979_v49 = vld [vmem:[%s1266_s1 + $0x170] sm:$0xff] }
  0x10   :  { %553 = vmatpush.bf16.msra.mxu2 %v953_v14  ;;  %v982_v40 = vld [vmem:[%s1266_s1 + $0x188] sm:$0xff]  ;;  %v676_v45 = vor.u32 %v920_v38, %v673_v39  ;;  %v969_v52 = vld [vmem:[%s1266_s1 + $0x120] sm:$0xff]  ;;  %v691_v54 = vld [vmem:[%s1268_s0 + $0x38] sm:$0xf] }
  0x11   :  { %572 = vmatpush.bf16.msra.mxu3 %v961_v15  ;;  %v970_v50 = vld [vmem:[%s1266_s1 + $0x128] sm:$0xff]  ;;  %v977_v53 = vld [vmem:[%s1266_s1 + $0x160] sm:$0xff]  ;;  %v929_v55 = vld [vmem:[%s1268_s0 + $0x50] sm:$0xf0] }
  0x12   :  { %516 = vmatpush.bf16.msra.mxu0 %v936_v16  ;;  %v978_v51 = vld [vmem:[%s1266_s1 + $0x168] sm:$0xff]  ;;  %v926_v56 = vld [vmem:[%s1268_s0 + $0x3c] sm:$0xf]  ;;  %v693_v57 = vld [vmem:[%s1268_s0 + $0x54] sm:$0xf0]  ;;  %v692_v63 = vor.u32 %v929_v55, %v691_v54 }
  0x13   :  { %535 = vmatpush.bf16.msra.mxu1 %v944_v17  ;;  %v699_v58 = vld [vmem:[%s1268_s0 + $0x40] sm:$0xf]  ;;  %v930_v59 = vld [vmem:[%s1268_s0 + $0x58] sm:$0xf0]  ;;  %v927_v60 = vld [vmem:[%s1268_s0 + $0x44] sm:$0xf]  ;;  %v696_v0 = vor.u32 %v926_v56, %v693_v57 }
  0x14   :  { %554 = vmatpush.bf16.msra.mxu2 %v952_v18  ;;  %v701_v61 = vld [vmem:[%s1268_s0 + $0x5c] sm:$0xf0]  ;;  %v968_v62 = vld [vmem:[%s1266_s1 + $0x118] sm:$0xff]  ;;  %v700_v1 = vor.u32 %v930_v59, %v699_v58  ;;  %v967_v4 = vld [vmem:[%s1266_s1 + $0x110] sm:$0xff] }
  0x15   :  { %573 = vmatpush.bf16.msra.mxu3 %v960_v19  ;;  %v704_v2 = vor.u32 %v927_v60, %v701_v61  ;;  %v976_v3 = vld [vmem:[%s1266_s1 + $0x158] sm:$0xff]  ;;  %v975_v5 = vld [vmem:[%s1266_s1 + $0x150] sm:$0xff]  ;;  %v966_v6 = vld [vmem:[%s1266_s1 + $0x108] sm:$0xff] }
  0x16   :  { %517 = vmatpush.bf16.msra.mxu0 %v935_v20  ;;  %v974_v7 = vld [vmem:[%s1266_s1 + $0x148] sm:$0xff]  ;;  %v965_v8 = vld [vmem:[%s1266_s1 + $0x100] sm:$0xff]  ;;  %v679_v10 = vld [vmem:[%s1268_s0 + $0x10] sm:$0xf] }
  0x17   :  { %536 = vmatpush.bf16.msra.mxu1 %v943_v21  ;;  %v973_v9 = vld [vmem:[%s1266_s1 + $0x140] sm:$0xff]  ;;  %v924_v11 = vld [vmem:[%s1268_s0 + $0x28] sm:$0xf0]  ;;  %v707_v12 = vld [vmem:[%s1268_s0 + $0x48] sm:$0xf] }
  0x18   :  { %555 = vmatpush.bf16.msra.mxu2 %v951_v22  ;;  %v931_v13 = vld [vmem:[%s1268_s0 + $0x60] sm:$0xf0]  ;;  %v921_v14 = vld [vmem:[%s1268_s0 + $0x14] sm:$0xf]  ;;  %v681_v15 = vld [vmem:[%s1268_s0 + $0x2c] sm:$0xf0]  ;;  %v680_v18 = vor.u32 %v924_v11, %v679_v10 }
  0x19   :  { %574 = vmatpush.bf16.msra.mxu3 %v959_v23  ;;  %v687_v16 = vld [vmem:[%s1268_s0 + $0x18] sm:$0xf]  ;;  %v925_v17 = vld [vmem:[%s1268_s0 + $0x30] sm:$0xf0]  ;;  %v708_v19 = vor.u32 %v931_v13, %v707_v12  ;;  %v684_v20 = vor.u32 %v921_v14, %v681_v15  ;;  %v928_v22 = vld [vmem:[%s1268_s0 + $0x4c] sm:$0xf] }
  0x1a   :  { %518 = vmatpush.bf16.msra.mxu0 %v934_v24  ;;  %v688_v21 = vor.u32 %v925_v17, %v687_v16  ;;  %v709_v23 = vld [vmem:[%s1268_s0 + $0x64] sm:$0xf0]  ;;  %v715_v24 = vld [vmem:[%s1268_s0 + $0x50] sm:$0xf]  ;;  %v1002_v38 = vld [vmem:[%s1267_s2] ss:$0 sm:$0xff] }
  0x1b   :  { %537 = vmatpush.bf16.msra.mxu1 %v942_v25  ;;  %v932_v25 = vld [vmem:[%s1268_s0 + $0x68] sm:$0xf0] }
  0x1c   :  { %556 = vmatpush.bf16.msra.mxu2 %v950_v26  ;;  %v712_v26 = vor.u32 %v928_v22, %v709_v23 }
  0x1d   :  { %575 = vmatpush.bf16.msra.mxu3 %v958_v27  ;;  %v716_v27 = vor.u32 %v932_v25, %v715_v24 }
  0x1e   :  { %519 = vmatpush.bf16.msra.mxu0 %v933_v28 }
  0x1f   :  { %538 = vmatpush.bf16.msra.mxu1 %v941_v29 }
  0x20   :  { %557 = vmatpush.bf16.msra.mxu2 %v949_v30 }
  0x21   :  { %576 = vmatpush.bf16.msra.mxu3 %v957_v31  ;;  %520 = vmatmul.bf16.vlgmr.msra.gmra.mxu0 %v664_v42 }
  0x22   :  { %588 = vmatpush.bf16.msrb.mxu0 %v972_v41  ;;  %539 = vmatmul.bf16.vlgmr.msra.gmra.mxu1 %v668_v43 }
  0x23   :  { %558 = vmatmul.bf16.vlgmr.msra.gmra.mxu2 %v672_v44  ;;  %607 = vmatpush.bf16.msrb.mxu1 %v980_v46 }
  0x24   :  { %632 = vmatpush.bf16.msrb.mxu2 %v982_v40  ;;  %577 = vmatmul.bf16.vlgmr.msra.gmra.mxu3 %v676_v45 }
  0x25   :  { %994 = vmatpush.bf16.msrb.mxu3 %v972_v41 }
  0x26   :  { %589 = vmatpush.bf16.msrb.mxu0 %v971_v47 }
  0x27   :  { %608 = vmatpush.bf16.msrb.mxu1 %v979_v49 }
  0x28   :  { %633 = vmatpush.bf16.msrb.mxu2 %v981_v48 }
  0x29   :  { %995 = vmatpush.bf16.msrb.mxu3 %v971_v47 }
  0x2a   :  { %590 = vmatpush.bf16.msrb.mxu0 %v970_v50 }
  0x2b   :  { %609 = vmatpush.bf16.msrb.mxu1 %v978_v51 }
  0x2d   :  { %996 = vmatpush.bf16.msrb.mxu3 %v970_v50 }
  0x2e   :  { %591 = vmatpush.bf16.msrb.mxu0 %v969_v52 }
  0x2f   :  { %610 = vmatpush.bf16.msrb.mxu1 %v977_v53 }
  0x31   :  { %997 = vmatpush.bf16.msrb.mxu3 %v969_v52  ;;  %525 = vmatmul.bf16.gmra.mxu0 %v692_v63 }
  0x32   :  { %592 = vmatpush.bf16.msrb.mxu0 %v968_v62  ;;  %544 = vmatmul.bf16.gmra.mxu1 %v696_v0 }
  0x33   :  { %563 = vmatmul.bf16.gmra.mxu2 %v700_v1  ;;  %611 = vmatpush.bf16.msrb.mxu1 %v976_v3 }
  0x34   :  { %582 = vmatmul.bf16.gmra.mxu3 %v704_v2 }
  0x35   :  { %998 = vmatpush.bf16.msrb.mxu3 %v968_v62 }
  0x36   :  { %593 = vmatpush.bf16.msrb.mxu0 %v967_v4 }
  0x37   :  { %612 = vmatpush.bf16.msrb.mxu1 %v975_v5 }
  0x39   :  { %999 = vmatpush.bf16.msrb.mxu3 %v967_v4 }
  0x3a   :  { %594 = vmatpush.bf16.msrb.mxu0 %v966_v6 }
  0x3b   :  { %613 = vmatpush.bf16.msrb.mxu1 %v974_v7 }
  0x3d   :  { %1000 = vmatpush.bf16.msrb.mxu3 %v966_v6 }
  0x3e   :  { %595 = vmatpush.bf16.msrb.mxu0 %v965_v8 }
  0x3f   :  { %614 = vmatpush.bf16.msrb.mxu1 %v973_v9 }
  0x41   :  { %1001 = vmatpush.bf16.msrb.mxu3 %v965_v8  ;;  %596 = vmatmul.bf16.vlgmr.msrb.gmra.mxu0 %v680_v18 }
  0x42   :  { %615 = vmatmul.bf16.vlgmr.msrb.gmra.mxu1 %v684_v20 }
  0x43   :  { %917 = vmatmul.msk.bf16.vlgmr.msrb.gmra.mxu2 %vm505_vm0, %v688_v21 }
  0x44   :  { %601 = vmatmul.bf16.vlgmr.msrb.gmra.mxu3 %v708_v19 }
  0x52   :  { %620 = vmatmul.bf16.gmra.mxu1 %v712_v26 }
  0x53   :  { %918 = vmatmul.msk.bf16.gmra.mxu2 %vm505_vm0, %v716_v27 }
  0x9e   :  { %v521_v28 = vpop.f32.mrf.mxu0 }
  0x9f   :  { %v540_v29 = vpop.f32.mrf.mxu1  ;;  %v522_v42 = vadd.f32 %v1002_v38, %v521_v28 }
  0xa1   :  { %v541_v44 = vadd.f32 %v540_v29, %v522_v42 }
  0xa6   :  { %v559_v30 = vpop.f32.mrf.mxu2  ;;  %v523_v32 = vpop.f32.mrf.mxu0 }
  0xa7   :  { %v578_v31 = vpop.f32.mrf.mxu3  ;;  %v542_v33 = vpop.f32.mrf.mxu1  ;;  %v524_v45 = vadd.f32 %v1002_v38, %v523_v32  ;;  %v560_v49 = vadd.f32 %v559_v30, %v541_v44 }
  0xa9   :  { %v543_v50 = vadd.f32 %v542_v33, %v524_v45  ;;  %v579_v53 = vadd.f32 %v578_v31, %v560_v49 }
  0xae   :  { %v561_v34 = vpop.f32.mrf.mxu2  ;;  %v526_v35 = vpop.f32.mrf.mxu0 }
  0xaf   :  { %v545_v36 = vpop.f32.mrf.mxu1  ;;  %v580_v37 = vpop.f32.mrf.mxu3  ;;  %v562_v51 = vadd.f32 %v561_v34, %v543_v50  ;;  %v527_v60 = vadd.f32 %v1002_v38, %v526_v35 }
  0xb1   :  { %v581_v56 = vadd.f32 %v580_v37, %v562_v51  ;;  %v546_v2 = vadd.f32 %v545_v36, %v527_v60 }
  0xb6   :  { %v564_v39 = vpop.f32.mrf.mxu2  ;;  %v528_v40 = vpop.f32.mrf.mxu0 }
  0xb7   :  { %v547_v41 = vpop.f32.mrf.mxu1  ;;  %v583_v43 = vpop.f32.mrf.mxu3  ;;  %v529_v3 = vadd.f32 %v1002_v38, %v528_v40  ;;  %v565_v8 = vadd.f32 %v564_v39, %v546_v2 }
  0xb9   :  { %v548_v9 = vadd.f32 %v547_v41, %v529_v3  ;;  %v584_v13 = vadd.f32 %v583_v43, %v565_v8 }
  0xbe   :  { %v566_v46 = vpop.f32.mrf.mxu2  ;;  %v597_v47 = vpop.f32.mrf.mxu0 }
  0xbf   :  { %v616_v48 = vpop.f32.mrf.mxu1  ;;  %v585_v52 = vpop.f32.mrf.mxu3  ;;  %v598_v57 = vadd.f32 %v597_v47, %v579_v53  ;;  %v567_v11 = vadd.f32 %v566_v46, %v548_v9 }
  0xc1   :  { %v617_v61 = vadd.f32 %v616_v48, %v598_v57  ;;  %v586_v15 = vadd.f32 %v585_v52, %v567_v11 }
  0xc6   :  { %v635_v54 = vpop.f32.mrf.mxu2  ;;  %v599_v55 = vpop.f32.mrf.mxu0 }
  0xc7   :  { %v618_v58 = vpop.f32.mrf.mxu1  ;;  %v600_v59 = vadd.f32 %v599_v55, %v581_v56  ;;  %v636_v62 = vadd.f32 %v635_v54, %v617_v61  ;;  %v602_v0 = vpop.f32.mrf.mxu3 }
  0xc8   :  { %v603_v16 = vadd.f32 %v602_v0, %v584_v13 }
  0xc9   :  { %v619_v63 = vadd.f32 %v618_v58, %v600_v59  ;;  %v645_v6 = vmax.f32 %v636_v62, 0.0 }
  0xce   :  { %v637_v1 = vpop.f32.mrf.mxu2 }
  0xcf   :  { %v638_v4 = vadd.f32 %v637_v1, %v619_v63  ;;  %v621_v5 = vpop.f32.mrf.mxu1  ;;  %v604_v14 = vpop.f32.mrf.mxu3 }
  0xd0   :  { %v605_v18 = vadd.f32 %v604_v14, %v586_v15  ;;  %v622_v19 = vadd.f32 %v621_v5, %v603_v16 }
  0xd1   :  { %v646_v7 = vmax.f32 %v638_v4, 0.0 }
  0xd3   :  { %v986_v10 = vpack.c.bf16 %v646_v7, %v645_v6 }
  0xd5   :  { %987 = vst [vmem:[%s1269_s3] sm:$0xff] %v986_v10  }
  0xd6   :  { %v640_v12 = vpop.f32.mrf.mxu2 }
  0xd7   :  { %v623_v17 = vpop.f32.mrf.mxu1  ;;  %v641_v20 = vadd.f32 %v640_v12, %v622_v19 }
  0xd8   :  { %v624_v21 = vadd.f32 %v623_v17, %v605_v18 }
  0xd9   :  { %v647_v24 = vmax.f32 %v641_v20, 0.0 }
  0xde   :  { %v642_v22 = vpop.f32.mrf.mxu2 }
  0xdf   :  { %v643_v23 = vadd.f32 %v642_v22, %v624_v21 }
  0xe1   :  { %v648_v25 = vmax.f32 %v643_v23, 0.0 }
  0xe3   :  { %v991_v26 = vpack.c.bf16 %v648_v25, %v647_v24 }
  0xe5   :  { %993 = vst [vmem:[%s1269_s3 + $0x8] sm:$0xff] %v991_v26  }

// kernel: discriminator_forward.7
= control target key start
LH: loop header
LB: loop body
LE: loop exit
PB: predicated region body
PF: predicated region fallthrough
CT: control target
= control target key end

     0   :  { %s2582_s1 = inlined_call_operand.vmem [shape: bf16[2048,128], index: 1, kind: input, shape index: {}]   ;;  %s2583_s0 = inlined_call_operand.vmem [shape: bf16[16,2048], index: 0, kind: input, shape index: {}]   ;;  %s2584_s2 = inlined_call_operand.vmem [shape: f32[16,128], index: 2, kind: output, shape index: {}]  }
   0x1   :  { %v1960_v0 = vld [vmem:[%s2582_s1 + $0x38] sm:$0xff]  ;;  %v1959_v4 = vld [vmem:[%s2582_s1 + $0x30] sm:$0xff]  ;;  %v1958_v8 = vld [vmem:[%s2582_s1 + $0x28] sm:$0xff] }
   0x2   :  { %v1968_v1 = vld [vmem:[%s2582_s1 + $0x78] sm:$0xff]  ;;  %1131 = vmatpush.bf16.msra.mxu0 %v1960_v0  ;;  %v1967_v5 = vld [vmem:[%s2582_s1 + $0x70] sm:$0xff]  ;;  %v1966_v9 = vld [vmem:[%s2582_s1 + $0x68] sm:$0xff] }
   0x3   :  { %v1976_v2 = vld [vmem:[%s2582_s1 + $0xb8] sm:$0xff]  ;;  %1145 = vmatpush.bf16.msra.mxu1 %v1968_v1  ;;  %v1975_v6 = vld [vmem:[%s2582_s1 + $0xb0] sm:$0xff]  ;;  %v1974_v10 = vld [vmem:[%s2582_s1 + $0xa8] sm:$0xff] }
   0x4   :  { %v1984_v3 = vld [vmem:[%s2582_s1 + $0xf8] sm:$0xff]  ;;  %1159 = vmatpush.bf16.msra.mxu2 %v1976_v2  ;;  %v1983_v7 = vld [vmem:[%s2582_s1 + $0xf0] sm:$0xff]  ;;  %v1982_v11 = vld [vmem:[%s2582_s1 + $0xe8] sm:$0xff] }
   0x5   :  { %1173 = vmatpush.bf16.msra.mxu3 %v1984_v3  ;;  %v1957_v12 = vld [vmem:[%s2582_s1 + $0x20] sm:$0xff]  ;;  %v1956_v16 = vld [vmem:[%s2582_s1 + $0x18] sm:$0xff]  ;;  %v1955_v20 = vld [vmem:[%s2582_s1 + $0x10] sm:$0xff] }
   0x6   :  { %1132 = vmatpush.bf16.msra.mxu0 %v1959_v4  ;;  %v1965_v13 = vld [vmem:[%s2582_s1 + $0x60] sm:$0xff]  ;;  %v1964_v17 = vld [vmem:[%s2582_s1 + $0x58] sm:$0xff]  ;;  %v1963_v21 = vld [vmem:[%s2582_s1 + $0x50] sm:$0xff] }
   0x7   :  { %1146 = vmatpush.bf16.msra.mxu1 %v1967_v5  ;;  %v1973_v14 = vld [vmem:[%s2582_s1 + $0xa0] sm:$0xff]  ;;  %v1972_v18 = vld [vmem:[%s2582_s1 + $0x98] sm:$0xff]  ;;  %v1971_v22 = vld [vmem:[%s2582_s1 + $0x90] sm:$0xff] }
   0x8   :  { %1160 = vmatpush.bf16.msra.mxu2 %v1975_v6  ;;  %v1981_v15 = vld [vmem:[%s2582_s1 + $0xe0] sm:$0xff]  ;;  %v1980_v19 = vld [vmem:[%s2582_s1 + $0xd8] sm:$0xff]  ;;  %v1979_v23 = vld [vmem:[%s2582_s1 + $0xd0] sm:$0xff] }
   0x9   :  { %1174 = vmatpush.bf16.msra.mxu3 %v1983_v7  ;;  %v1954_v24 = vld [vmem:[%s2582_s1 + $0x8] sm:$0xff]  ;;  %v1953_v28 = vld [vmem:[%s2582_s1] sm:$0xff]  ;;  %v1992_v32 = vld [vmem:[%s2582_s1 + $0x138] sm:$0xff] }
   0xa   :  { %1133 = vmatpush.bf16.msra.mxu0 %v1958_v8  ;;  %v1962_v25 = vld [vmem:[%s2582_s1 + $0x48] sm:$0xff]  ;;  %v1961_v29 = vld [vmem:[%s2582_s1 + $0x40] sm:$0xff]  ;;  %v2000_v33 = vld [vmem:[%s2582_s1 + $0x178] sm:$0xff] }
   0xb   :  { %1147 = vmatpush.bf16.msra.mxu1 %v1966_v9  ;;  %v1970_v26 = vld [vmem:[%s2582_s1 + $0x88] sm:$0xff]  ;;  %v1969_v30 = vld [vmem:[%s2582_s1 + $0x80] sm:$0xff]  ;;  %v2008_v42 = vld [vmem:[%s2582_s1 + $0x1b8] sm:$0xff] }
   0xc   :  { %1161 = vmatpush.bf16.msra.mxu2 %v1974_v10  ;;  %v1978_v27 = vld [vmem:[%s2582_s1 + $0xc8] sm:$0xff]  ;;  %v1977_v31 = vld [vmem:[%s2582_s1 + $0xc0] sm:$0xff]  ;;  %v2016_v43 = vld [vmem:[%s2582_s1 + $0x1f8] sm:$0xff] }
   0xd   :  { %1175 = vmatpush.bf16.msra.mxu3 %v1982_v11  ;;  %v1363_v34 = vld [vmem:[%s2583_s0] sm:$0xf]  ;;  %v1371_v36 = vld [vmem:[%s2583_s0 + $0x8] sm:$0xf]  ;;  %v1937_v38 = vld [vmem:[%s2583_s0 + $0x4] sm:$0xf] }
   0xe   :  { %1134 = vmatpush.bf16.msra.mxu0 %v1957_v12  ;;  %v1945_v35 = vld [vmem:[%s2583_s0 + $0x3c] sm:$0xf0]  ;;  %v1946_v37 = vld [vmem:[%s2583_s0 + $0x44] sm:$0xf0]  ;;  %v1365_v39 = vld [vmem:[%s2583_s0 + $0x40] sm:$0xf0] }
   0xf   :  { %1148 = vmatpush.bf16.msra.mxu1 %v1965_v13  ;;  %v1938_v40 = vld [vmem:[%s2583_s0 + $0xc] sm:$0xf]  ;;  %v1364_v44 = vor.u32 %v1945_v35, %v1363_v34  ;;  %v1372_v45 = vor.u32 %v1946_v37, %v1371_v36  ;;  %v1368_v46 = vor.u32 %v1937_v38, %v1365_v39  ;;  %v1991_v48 = vld [vmem:[%s2582_s1 + $0x130] sm:$0xff]  ;;  %v1989_v56 = vld [vmem:[%s2582_s1 + $0x120] sm:$0xff] }
  0x10   :  { %1162 = vmatpush.bf16.msra.mxu2 %v1973_v14  ;;  %v1373_v41 = vld [vmem:[%s2583_s0 + $0x48] sm:$0xf0]  ;;  %v1999_v49 = vld [vmem:[%s2582_s1 + $0x170] sm:$0xff]  ;;  %v1997_v57 = vld [vmem:[%s2582_s1 + $0x160] sm:$0xff] }
  0x11   :  { %1176 = vmatpush.bf16.msra.mxu3 %v1981_v15  ;;  %v1376_v47 = vor.u32 %v1938_v40, %v1373_v41  ;;  %v2007_v50 = vld [vmem:[%s2582_s1 + $0x1b0] sm:$0xff]  ;;  %v1990_v52 = vld [vmem:[%s2582_s1 + $0x128] sm:$0xff]  ;;  %v2005_v58 = vld [vmem:[%s2582_s1 + $0x1a0] sm:$0xff] }
  0x12   :  { %1135 = vmatpush.bf16.msra.mxu0 %v1956_v16  ;;  %v2015_v51 = vld [vmem:[%s2582_s1 + $0x1f0] sm:$0xff]  ;;  %v1998_v53 = vld [vmem:[%s2582_s1 + $0x168] sm:$0xff]  ;;  %v2013_v59 = vld [vmem:[%s2582_s1 + $0x1e0] sm:$0xff] }
  0x13   :  { %1149 = vmatpush.bf16.msra.mxu1 %v1964_v17  ;;  %v2006_v54 = vld [vmem:[%s2582_s1 + $0x1a8] sm:$0xff]  ;;  %v1988_v60 = vld [vmem:[%s2582_s1 + $0x118] sm:$0xff]  ;;  %v1987_v0 = vld [vmem:[%s2582_s1 + $0x110] sm:$0xff] }
  0x14   :  { %1163 = vmatpush.bf16.msra.mxu2 %v1972_v18  ;;  %v2014_v55 = vld [vmem:[%s2582_s1 + $0x1e8] sm:$0xff]  ;;  %v1996_v61 = vld [vmem:[%s2582_s1 + $0x158] sm:$0xff]  ;;  %v1995_v1 = vld [vmem:[%s2582_s1 + $0x150] sm:$0xff] }
  0x15   :  { %1177 = vmatpush.bf16.msra.mxu3 %v1980_v19  ;;  %v2004_v62 = vld [vmem:[%s2582_s1 + $0x198] sm:$0xff]  ;;  %v2003_v2 = vld [vmem:[%s2582_s1 + $0x190] sm:$0xff]  ;;  %v1986_v4 = vld [vmem:[%s2582_s1 + $0x108] sm:$0xff] }
  0x16   :  { %1136 = vmatpush.bf16.msra.mxu0 %v1955_v20  ;;  %v2012_v63 = vld [vmem:[%s2582_s1 + $0x1d8] sm:$0xff]  ;;  %v2011_v3 = vld [vmem:[%s2582_s1 + $0x1d0] sm:$0xff]  ;;  %v1994_v5 = vld [vmem:[%s2582_s1 + $0x148] sm:$0xff] }
  0x17   :  { %1150 = vmatpush.bf16.msra.mxu1 %v1963_v21  ;;  %v2002_v6 = vld [vmem:[%s2582_s1 + $0x188] sm:$0xff]  ;;  %v1985_v8 = vld [vmem:[%s2582_s1 + $0x100] sm:$0xff]  ;;  %v2024_v12 = vld [vmem:[%s2582_s1 + $0x238] sm:$0xff] }
  0x18   :  { %1164 = vmatpush.bf16.msra.mxu2 %v1971_v22  ;;  %v2010_v7 = vld [vmem:[%s2582_s1 + $0x1c8] sm:$0xff]  ;;  %v1993_v9 = vld [vmem:[%s2582_s1 + $0x140] sm:$0xff]  ;;  %v2032_v13 = vld [vmem:[%s2582_s1 + $0x278] sm:$0xff] }
  0x19   :  { %1178 = vmatpush.bf16.msra.mxu3 %v1979_v23  ;;  %v2001_v10 = vld [vmem:[%s2582_s1 + $0x180] sm:$0xff]  ;;  %v1379_v14 = vld [vmem:[%s2583_s0 + $0x10] sm:$0xf]  ;;  %v1387_v16 = vld [vmem:[%s2583_s0 + $0x18] sm:$0xf] }
  0x1a   :  { %1137 = vmatpush.bf16.msra.mxu0 %v1954_v24  ;;  %v2009_v11 = vld [vmem:[%s2582_s1 + $0x1c0] sm:$0xff]  ;;  %v1947_v15 = vld [vmem:[%s2583_s0 + $0x4c] sm:$0xf0]  ;;  %v1948_v17 = vld [vmem:[%s2583_s0 + $0x54] sm:$0xf0] }
  0x1b   :  { %1151 = vmatpush.bf16.msra.mxu1 %v1962_v25  ;;  %v1939_v18 = vld [vmem:[%s2583_s0 + $0x14] sm:$0xf]  ;;  %v1940_v20 = vld [vmem:[%s2583_s0 + $0x1c] sm:$0xf]  ;;  %v1380_v24 = vor.u32 %v1947_v15, %v1379_v14  ;;  %v1388_v25 = vor.u32 %v1948_v17, %v1387_v16  ;;  %v2038_v34 = vld [vmem:[%s2582_s1 + $0x2a8] sm:$0xff] }
  0x1c   :  { %1165 = vmatpush.bf16.msra.mxu2 %v1970_v26  ;;  %v1381_v19 = vld [vmem:[%s2583_s0 + $0x50] sm:$0xf0]  ;;  %v1389_v21 = vld [vmem:[%s2583_s0 + $0x58] sm:$0xf0]  ;;  %v2046_v35 = vld [vmem:[%s2582_s1 + $0x2e8] sm:$0xff] }
  0x1d   :  { %1179 = vmatpush.bf16.msra.mxu3 %v1978_v27  ;;  %v2040_v22 = vld [vmem:[%s2582_s1 + $0x2b8] sm:$0xff]  ;;  %v1384_v26 = vor.u32 %v1939_v18, %v1381_v19  ;;  %v1392_v27 = vor.u32 %v1940_v20, %v1389_v21  ;;  %v2021_v36 = vld [vmem:[%s2582_s1 + $0x220] sm:$0xff]  ;;  %v2070_v14 = vld [vmem:[%s2582_s1 + $0x3a8] sm:$0xff] }
  0x1e   :  { %1138 = vmatpush.bf16.msra.mxu0 %v1953_v28  ;;  %v2048_v23 = vld [vmem:[%s2582_s1 + $0x2f8] sm:$0xff]  ;;  %v2023_v28 = vld [vmem:[%s2582_s1 + $0x230] sm:$0xff]  ;;  %v2029_v37 = vld [vmem:[%s2582_s1 + $0x260] sm:$0xff] }
  0x1f   :  { %1152 = vmatpush.bf16.msra.mxu1 %v1961_v29  ;;  %v2031_v29 = vld [vmem:[%s2582_s1 + $0x270] sm:$0xff]  ;;  %v2037_v38 = vld [vmem:[%s2582_s1 + $0x2a0] sm:$0xff]  ;;  %v2020_v40 = vld [vmem:[%s2582_s1 + $0x218] sm:$0xff] }
  0x20   :  { %1166 = vmatpush.bf16.msra.mxu2 %v1969_v30  ;;  %v2039_v30 = vld [vmem:[%s2582_s1 + $0x2b0] sm:$0xff]  ;;  %v2045_v39 = vld [vmem:[%s2582_s1 + $0x2e0] sm:$0xff]  ;;  %v2028_v41 = vld [vmem:[%s2582_s1 + $0x258] sm:$0xff] }
  0x21   :  { %1180 = vmatpush.bf16.msra.mxu3 %v1977_v31  ;;  %1139 = vmatmul.bf16.vlgmr.msra.gmra.mxu0 %v1364_v44  ;;  %v2047_v31 = vld [vmem:[%s2582_s1 + $0x2f0] sm:$0xff]  ;;  %v2078_v15 = vld [vmem:[%s2582_s1 + $0x3e8] sm:$0xff]  ;;  %v2053_v16 = vld [vmem:[%s2582_s1 + $0x320] sm:$0xff] }
  0x22   :  { %1187 = vmatpush.bf16.msrb.mxu0 %v1992_v32  ;;  %1153 = vmatmul.bf16.vlgmr.msra.gmra.mxu1 %v1368_v46  ;;  %v2022_v32 = vld [vmem:[%s2582_s1 + $0x228] sm:$0xff]  ;;  %v2019_v44 = vld [vmem:[%s2582_s1 + $0x210] sm:$0xff]  ;;  %v2061_v17 = vld [vmem:[%s2582_s1 + $0x360] sm:$0xff] }
  0x23   :  { %1201 = vmatpush.bf16.msrb.mxu1 %v2000_v33  ;;  %1167 = vmatmul.bf16.vlgmr.msra.gmra.mxu2 %v1372_v45  ;;  %v2030_v33 = vld [vmem:[%s2582_s1 + $0x268] sm:$0xff]  ;;  %v2027_v45 = vld [vmem:[%s2582_s1 + $0x250] sm:$0xff]  ;;  %v2069_v18 = vld [vmem:[%s2582_s1 + $0x3a0] sm:$0xff] }
  0x24   :  { %1215 = vmatpush.bf16.msrb.mxu2 %v2008_v42  ;;  %1181 = vmatmul.bf16.vlgmr.msra.gmra.mxu3 %v1376_v47  ;;  %v2036_v42 = vld [vmem:[%s2582_s1 + $0x298] sm:$0xff]  ;;  %v2035_v46 = vld [vmem:[%s2582_s1 + $0x290] sm:$0xff]  ;;  %v2077_v19 = vld [vmem:[%s2582_s1 + $0x3e0] sm:$0xff] }
  0x25   :  { %1229 = vmatpush.bf16.msrb.mxu3 %v2016_v43  ;;  %v2044_v43 = vld [vmem:[%s2582_s1 + $0x2d8] sm:$0xff]  ;;  %v2043_v47 = vld [vmem:[%s2582_s1 + $0x2d0] sm:$0xff] }
  0x26   :  { %1188 = vmatpush.bf16.msrb.mxu0 %v1991_v48  ;;  %v2018_v48 = vld [vmem:[%s2582_s1 + $0x208] sm:$0xff]  ;;  %v2052_v20 = vld [vmem:[%s2582_s1 + $0x318] sm:$0xff] }
  0x27   :  { %1202 = vmatpush.bf16.msrb.mxu1 %v1999_v49  ;;  %v2026_v49 = vld [vmem:[%s2582_s1 + $0x248] sm:$0xff]  ;;  %v2060_v21 = vld [vmem:[%s2582_s1 + $0x358] sm:$0xff] }
  0x28   :  { %1216 = vmatpush.bf16.msrb.mxu2 %v2007_v50  ;;  %v2034_v50 = vld [vmem:[%s2582_s1 + $0x288] sm:$0xff] }
  0x29   :  { %1230 = vmatpush.bf16.msrb.mxu3 %v2015_v51  ;;  %v2042_v51 = vld [vmem:[%s2582_s1 + $0x2c8] sm:$0xff] }
  0x2a   :  { %1189 = vmatpush.bf16.msrb.mxu0 %v1990_v52  ;;  %v2017_v52 = vld [vmem:[%s2582_s1 + $0x200] sm:$0xff] }
  0x2b   :  { %1203 = vmatpush.bf16.msrb.mxu1 %v1998_v53  ;;  %v2025_v53 = vld [vmem:[%s2582_s1 + $0x240] sm:$0xff] }
  0x2c   :  { %1217 = vmatpush.bf16.msrb.mxu2 %v2006_v54  ;;  %v2033_v54 = vld [vmem:[%s2582_s1 + $0x280] sm:$0xff] }
  0x2d   :  { %1231 = vmatpush.bf16.msrb.mxu3 %v2014_v55  ;;  %v2041_v55 = vld [vmem:[%s2582_s1 + $0x2c0] sm:$0xff] }
  0x2e   :  { %1190 = vmatpush.bf16.msrb.mxu0 %v1989_v56  ;;  %v2056_v56 = vld [vmem:[%s2582_s1 + $0x338] sm:$0xff] }
  0x2f   :  { %1204 = vmatpush.bf16.msrb.mxu1 %v1997_v57  ;;  %v2064_v57 = vld [vmem:[%s2582_s1 + $0x378] sm:$0xff] }
  0x30   :  { %1218 = vmatpush.bf16.msrb.mxu2 %v2005_v58  ;;  %v1395_v58 = vld [vmem:[%s2583_s0 + $0x20] sm:$0xf] }
  0x31   :  { %1232 = vmatpush.bf16.msrb.mxu3 %v2013_v59  ;;  %v1949_v59 = vld [vmem:[%s2583_s0 + $0x5c] sm:$0xf0] }
  0x32   :  { %1191 = vmatpush.bf16.msrb.mxu0 %v1988_v60  ;;  %v1403_v60 = vld [vmem:[%s2583_s0 + $0x28] sm:$0xf] }
  0x33   :  { %1205 = vmatpush.bf16.msrb.mxu1 %v1996_v61  ;;  %v1950_v61 = vld [vmem:[%s2583_s0 + $0x64] sm:$0xf0] }
  0x34   :  { %1219 = vmatpush.bf16.msrb.mxu2 %v2004_v62  ;;  %v1941_v62 = vld [vmem:[%s2583_s0 + $0x24] sm:$0xf] }
  0x35   :  { %1233 = vmatpush.bf16.msrb.mxu3 %v2012_v63  ;;  %v1397_v63 = vld [vmem:[%s2583_s0 + $0x60] sm:$0xf0] }
  0x36   :  { %1192 = vmatpush.bf16.msrb.mxu0 %v1987_v0  ;;  %v1942_v0 = vld [vmem:[%s2583_s0 + $0x2c] sm:$0xf] }
  0x37   :  { %1206 = vmatpush.bf16.msrb.mxu1 %v1995_v1  ;;  %v1405_v1 = vld [vmem:[%s2583_s0 + $0x68] sm:$0xf0] }
  0x38   :  { %1220 = vmatpush.bf16.msrb.mxu2 %v2003_v2  ;;  %v2072_v2 = vld [vmem:[%s2582_s1 + $0x3b8] sm:$0xff] }
  0x39   :  { %1234 = vmatpush.bf16.msrb.mxu3 %v2011_v3  ;;  %v2080_v3 = vld [vmem:[%s2582_s1 + $0x3f8] sm:$0xff] }
  0x3a   :  { %1193 = vmatpush.bf16.msrb.mxu0 %v1986_v4  ;;  %v1396_v4 = vor.u32 %v1949_v59, %v1395_v58 }
  0x3b   :  { %1207 = vmatpush.bf16.msrb.mxu1 %v1994_v5  ;;  %v1404_v5 = vor.u32 %v1950_v61, %v1403_v60 }
  0x3c   :  { %1221 = vmatpush.bf16.msrb.mxu2 %v2002_v6  ;;  %v1400_v6 = vor.u32 %v1941_v62, %v1397_v63 }
  0x3d   :  { %1235 = vmatpush.bf16.msrb.mxu3 %v2010_v7  ;;  %v1408_v7 = vor.u32 %v1942_v0, %v1405_v1 }
  0x3e   :  { %1194 = vmatpush.bf16.msrb.mxu0 %v1985_v8  ;;  %v2055_v8 = vld [vmem:[%s2582_s1 + $0x330] sm:$0xff] }
  0x3f   :  { %1208 = vmatpush.bf16.msrb.mxu1 %v1993_v9  ;;  %v2063_v9 = vld [vmem:[%s2582_s1 + $0x370] sm:$0xff] }
  0x40   :  { %1222 = vmatpush.bf16.msrb.mxu2 %v2001_v10  ;;  %v2071_v10 = vld [vmem:[%s2582_s1 + $0x3b0] sm:$0xff] }
  0x41   :  { %1236 = vmatpush.bf16.msrb.mxu3 %v2009_v11  ;;  %1195 = vmatmul.bf16.vlgmr.msrb.gmra.mxu0 %v1380_v24  ;;  %v2079_v11 = vld [vmem:[%s2582_s1 + $0x3f0] sm:$0xff] }
  0x42   :  { %1243 = vmatpush.bf16.msra.mxu0 %v2024_v12  ;;  %1209 = vmatmul.bf16.vlgmr.msrb.gmra.mxu1 %v1384_v26  ;;  %v2054_v12 = vld [vmem:[%s2582_s1 + $0x328] sm:$0xff]  ;;  %v2051_v24 = vld [vmem:[%s2582_s1 + $0x310] sm:$0xff] }
  0x43   :  { %1257 = vmatpush.bf16.msra.mxu1 %v2032_v13  ;;  %1223 = vmatmul.bf16.vlgmr.msrb.gmra.mxu2 %v1388_v25  ;;  %v2062_v13 = vld [vmem:[%s2582_s1 + $0x368] sm:$0xff]  ;;  %v2059_v25 = vld [vmem:[%s2582_s1 + $0x350] sm:$0xff] }
  0x44   :  { %1271 = vmatpush.bf16.msra.mxu2 %v2040_v22  ;;  %1237 = vmatmul.bf16.vlgmr.msrb.gmra.mxu3 %v1392_v27  ;;  %v2068_v22 = vld [vmem:[%s2582_s1 + $0x398] sm:$0xff]  ;;  %v2067_v26 = vld [vmem:[%s2582_s1 + $0x390] sm:$0xff] }
  0x45   :  { %1285 = vmatpush.bf16.msra.mxu3 %v2048_v23  ;;  %v2076_v23 = vld [vmem:[%s2582_s1 + $0x3d8] sm:$0xff]  ;;  %v2075_v27 = vld [vmem:[%s2582_s1 + $0x3d0] sm:$0xff] }
  0x46   :  { %1244 = vmatpush.bf16.msra.mxu0 %v2023_v28  ;;  %v2050_v28 = vld [vmem:[%s2582_s1 + $0x308] sm:$0xff] }
  0x47   :  { %1258 = vmatpush.bf16.msra.mxu1 %v2031_v29  ;;  %v2058_v29 = vld [vmem:[%s2582_s1 + $0x348] sm:$0xff] }
  0x48   :  { %1272 = vmatpush.bf16.msra.mxu2 %v2039_v30  ;;  %v2066_v30 = vld [vmem:[%s2582_s1 + $0x388] sm:$0xff] }
  0x49   :  { %1286 = vmatpush.bf16.msra.mxu3 %v2047_v31  ;;  %v2074_v31 = vld [vmem:[%s2582_s1 + $0x3c8] sm:$0xff] }
  0x4a   :  { %1245 = vmatpush.bf16.msra.mxu0 %v2022_v32  ;;  %v2049_v32 = vld [vmem:[%s2582_s1 + $0x300] sm:$0xff] }
  0x4b   :  { %1259 = vmatpush.bf16.msra.mxu1 %v2030_v33  ;;  %v2057_v33 = vld [vmem:[%s2582_s1 + $0x340] sm:$0xff] }
  0x4c   :  { %1273 = vmatpush.bf16.msra.mxu2 %v2038_v34  ;;  %v2065_v34 = vld [vmem:[%s2582_s1 + $0x380] sm:$0xff] }
  0x4d   :  { %1287 = vmatpush.bf16.msra.mxu3 %v2046_v35  ;;  %v2073_v35 = vld [vmem:[%s2582_s1 + $0x3c0] sm:$0xff] }
  0x4e   :  { %1246 = vmatpush.bf16.msra.mxu0 %v2021_v36  ;;  %v1411_v36 = vld [vmem:[%s2583_s0 + $0x30] sm:$0xf] }
  0x4f   :  { %1260 = vmatpush.bf16.msra.mxu1 %v2029_v37  ;;  %v1951_v37 = vld [vmem:[%s2583_s0 + $0x6c] sm:$0xf0] }
  0x50   :  { %1274 = vmatpush.bf16.msra.mxu2 %v2037_v38  ;;  %v1943_v38 = vld [vmem:[%s2583_s0 + $0x34] sm:$0xf] }
  0x51   :  { %1288 = vmatpush.bf16.msra.mxu3 %v2045_v39  ;;  %v1413_v39 = vld [vmem:[%s2583_s0 + $0x70] sm:$0xf0] }
  0x52   :  { %1247 = vmatpush.bf16.msra.mxu0 %v2020_v40  ;;  %v1419_v40 = vld [vmem:[%s2583_s0 + $0x38] sm:$0xf] }
  0x53   :  { %1261 = vmatpush.bf16.msra.mxu1 %v2028_v41  ;;  %v1952_v41 = vld [vmem:[%s2583_s0 + $0x74] sm:$0xf0] }
  0x54   :  { %1275 = vmatpush.bf16.msra.mxu2 %v2036_v42  ;;  %v1944_v42 = vld [vmem:[%s2583_s0 + $0x3c] sm:$0xf] }
  0x55   :  { %1289 = vmatpush.bf16.msra.mxu3 %v2044_v43  ;;  %v1421_v43 = vld [vmem:[%s2583_s0 + $0x78] sm:$0xf0] }
  0x56   :  { %1248 = vmatpush.bf16.msra.mxu0 %v2019_v44  ;;  %v1412_v44 = vor.u32 %v1951_v37, %v1411_v36 }
  0x57   :  { %1262 = vmatpush.bf16.msra.mxu1 %v2027_v45  ;;  %v1416_v45 = vor.u32 %v1943_v38, %v1413_v39 }
  0x58   :  { %1276 = vmatpush.bf16.msra.mxu2 %v2035_v46  ;;  %v1420_v46 = vor.u32 %v1952_v41, %v1419_v40 }
  0x59   :  { %1290 = vmatpush.bf16.msra.mxu3 %v2043_v47  ;;  %v1424_v47 = vor.u32 %v1944_v42, %v1421_v43 }
  0x5a   :  { %1249 = vmatpush.bf16.msra.mxu0 %v2018_v48 }
  0x5b   :  { %1263 = vmatpush.bf16.msra.mxu1 %v2026_v49 }
  0x5c   :  { %1277 = vmatpush.bf16.msra.mxu2 %v2034_v50 }
  0x5d   :  { %1291 = vmatpush.bf16.msra.mxu3 %v2042_v51 }
  0x5e   :  { %1250 = vmatpush.bf16.msra.mxu0 %v2017_v52 }
  0x5f   :  { %1264 = vmatpush.bf16.msra.mxu1 %v2025_v53 }
  0x60   :  { %1278 = vmatpush.bf16.msra.mxu2 %v2033_v54 }
  0x61   :  { %1292 = vmatpush.bf16.msra.mxu3 %v2041_v55  ;;  %1251 = vmatmul.bf16.vlgmr.msra.gmra.mxu0 %v1396_v4 }
  0x62   :  { %1299 = vmatpush.bf16.msrb.mxu0 %v2056_v56  ;;  %1265 = vmatmul.bf16.vlgmr.msra.gmra.mxu1 %v1400_v6 }
  0x63   :  { %1313 = vmatpush.bf16.msrb.mxu1 %v2064_v57  ;;  %1279 = vmatmul.bf16.vlgmr.msra.gmra.mxu2 %v1404_v5 }
  0x64   :  { %1327 = vmatpush.bf16.msrb.mxu2 %v2072_v2  ;;  %1293 = vmatmul.bf16.vlgmr.msra.gmra.mxu3 %v1408_v7 }
  0x65   :  { %1341 = vmatpush.bf16.msrb.mxu3 %v2080_v3 }
  0x66   :  { %1300 = vmatpush.bf16.msrb.mxu0 %v2055_v8 }
  0x67   :  { %1314 = vmatpush.bf16.msrb.mxu1 %v2063_v9 }
  0x68   :  { %1328 = vmatpush.bf16.msrb.mxu2 %v2071_v10 }
  0x69   :  { %1342 = vmatpush.bf16.msrb.mxu3 %v2079_v11 }
  0x6a   :  { %1301 = vmatpush.bf16.msrb.mxu0 %v2054_v12 }
  0x6b   :  { %1315 = vmatpush.bf16.msrb.mxu1 %v2062_v13 }
  0x6c   :  { %1329 = vmatpush.bf16.msrb.mxu2 %v2070_v14 }
  0x6d   :  { %1343 = vmatpush.bf16.msrb.mxu3 %v2078_v15 }
  0x6e   :  { %1302 = vmatpush.bf16.msrb.mxu0 %v2053_v16 }
  0x6f   :  { %1316 = vmatpush.bf16.msrb.mxu1 %v2061_v17 }
  0x70   :  { %1330 = vmatpush.bf16.msrb.mxu2 %v2069_v18 }
  0x71   :  { %1344 = vmatpush.bf16.msrb.mxu3 %v2077_v19 }
  0x72   :  { %1303 = vmatpush.bf16.msrb.mxu0 %v2052_v20 }
  0x73   :  { %1317 = vmatpush.bf16.msrb.mxu1 %v2060_v21 }
  0x74   :  { %1331 = vmatpush.bf16.msrb.mxu2 %v2068_v22 }
  0x75   :  { %1345 = vmatpush.bf16.msrb.mxu3 %v2076_v23 }
  0x76   :  { %1304 = vmatpush.bf16.msrb.mxu0 %v2051_v24 }
  0x77   :  { %1318 = vmatpush.bf16.msrb.mxu1 %v2059_v25 }
  0x78   :  { %1332 = vmatpush.bf16.msrb.mxu2 %v2067_v26 }
  0x79   :  { %1346 = vmatpush.bf16.msrb.mxu3 %v2075_v27 }
  0x7a   :  { %1305 = vmatpush.bf16.msrb.mxu0 %v2050_v28 }
  0x7b   :  { %1319 = vmatpush.bf16.msrb.mxu1 %v2058_v29 }
  0x7c   :  { %1333 = vmatpush.bf16.msrb.mxu2 %v2066_v30 }
  0x7d   :  { %1347 = vmatpush.bf16.msrb.mxu3 %v2074_v31 }
  0x7e   :  { %1306 = vmatpush.bf16.msrb.mxu0 %v2049_v32 }
  0x7f   :  { %1320 = vmatpush.bf16.msrb.mxu1 %v2057_v33 }
  0x80   :  { %1334 = vmatpush.bf16.msrb.mxu2 %v2065_v34 }
  0x81   :  { %1348 = vmatpush.bf16.msrb.mxu3 %v2073_v35  ;;  %1307 = vmatmul.bf16.vlgmr.msrb.gmra.mxu0 %v1412_v44 }
  0x82   :  { %1321 = vmatmul.bf16.vlgmr.msrb.gmra.mxu1 %v1416_v45 }
  0x83   :  { %1335 = vmatmul.bf16.vlgmr.msrb.gmra.mxu2 %v1420_v46 }
  0x84   :  { %1349 = vmatmul.bf16.vlgmr.msrb.gmra.mxu3 %v1424_v47 }
  0x9e   :  { %v1140_v48 = vpop.f32.mrf.mxu0 }
  0x9f   :  { %v1154_v49 = vpop.f32.mrf.mxu1 }
  0xa0   :  { %v1155_v56 = vadd.f32 %v1154_v49, %v1140_v48 }
  0xa6   :  { %v1168_v50 = vpop.f32.mrf.mxu2  ;;  %v1142_v52 = vpop.f32.mrf.mxu0 }
  0xa7   :  { %v1182_v51 = vpop.f32.mrf.mxu3  ;;  %v1156_v53 = vpop.f32.mrf.mxu1  ;;  %v1169_v59 = vadd.f32 %v1168_v50, %v1155_v56 }
  0xa8   :  { %v1157_v0 = vadd.f32 %v1156_v53, %v1142_v52 }
  0xa9   :  { %v1183_v62 = vadd.f32 %v1182_v51, %v1169_v59 }
  0xae   :  { %v1170_v54 = vpop.f32.mrf.mxu2 }
  0xaf   :  { %v1184_v55 = vpop.f32.mrf.mxu3  ;;  %v1171_v3 = vadd.f32 %v1170_v54, %v1157_v0 }
  0xb1   :  { %v1185_v8 = vadd.f32 %v1184_v55, %v1171_v3 }
  0xbe   :  { %v1196_v57 = vpop.f32.mrf.mxu0 }
  0xbf   :  { %v1210_v58 = vpop.f32.mrf.mxu1  ;;  %v1197_v1 = vadd.f32 %v1196_v57, %v1183_v62 }
  0xc1   :  { %v1211_v4 = vadd.f32 %v1210_v58, %v1197_v1 }
  0xc6   :  { %v1224_v60 = vpop.f32.mrf.mxu2  ;;  %v1198_v63 = vpop.f32.mrf.mxu0 }
  0xc7   :  { %v1238_v61 = vpop.f32.mrf.mxu3  ;;  %v1212_v2 = vpop.f32.mrf.mxu1  ;;  %v1225_v9 = vadd.f32 %v1224_v60, %v1211_v4  ;;  %v1199_v11 = vadd.f32 %v1198_v63, %v1185_v8 }
  0xc9   :  { %v1239_v12 = vadd.f32 %v1238_v61, %v1225_v9  ;;  %v1213_v15 = vadd.f32 %v1212_v2, %v1199_v11 }
  0xce   :  { %v1226_v5 = vpop.f32.mrf.mxu2 }
  0xcf   :  { %v1240_v6 = vpop.f32.mrf.mxu3  ;;  %v1227_v17 = vadd.f32 %v1226_v5, %v1213_v15 }
  0xd1   :  { %v1241_v21 = vadd.f32 %v1240_v6, %v1227_v17 }
  0xde   :  { %v1252_v7 = vpop.f32.mrf.mxu0 }
  0xdf   :  { %v1266_v10 = vpop.f32.mrf.mxu1  ;;  %v1253_v16 = vadd.f32 %v1252_v7, %v1239_v12 }
  0xe1   :  { %v1267_v19 = vadd.f32 %v1266_v10, %v1253_v16 }
  0xe6   :  { %v1280_v13 = vpop.f32.mrf.mxu2  ;;  %v1254_v18 = vpop.f32.mrf.mxu0 }
  0xe7   :  { %v1294_v14 = vpop.f32.mrf.mxu3  ;;  %v1268_v20 = vpop.f32.mrf.mxu1  ;;  %v1281_v22 = vadd.f32 %v1280_v13, %v1267_v19  ;;  %v1255_v23 = vadd.f32 %v1254_v18, %v1241_v21 }
  0xe9   :  { %v1295_v26 = vadd.f32 %v1294_v14, %v1281_v22  ;;  %v1269_v28 = vadd.f32 %v1268_v20, %v1255_v23 }
  0xee   :  { %v1282_v24 = vpop.f32.mrf.mxu2 }
  0xef   :  { %v1296_v25 = vpop.f32.mrf.mxu3  ;;  %v1283_v31 = vadd.f32 %v1282_v24, %v1269_v28 }
  0xf1   :  { %v1297_v35 = vadd.f32 %v1296_v25, %v1283_v31 }
  0xfe   :  { %v1308_v27 = vpop.f32.mrf.mxu0 }
  0xff   :  { %v1309_v29 = vadd.f32 %v1308_v27, %v1295_v26  ;;  %v1322_v30 = vpop.f32.mrf.mxu1 }
 0x101   :  { %v1323_v32 = vadd.f32 %v1322_v30, %v1309_v29 }
 0x106   :  { %v1336_v33 = vpop.f32.mrf.mxu2  ;;  %v1310_v37 = vpop.f32.mrf.mxu0 }
 0x107   :  { %v1350_v34 = vpop.f32.mrf.mxu3  ;;  %v1337_v36 = vadd.f32 %v1336_v33, %v1323_v32  ;;  %v1311_v39 = vadd.f32 %v1310_v37, %v1297_v35  ;;  %v1324_v40 = vpop.f32.mrf.mxu1 }
 0x109   :  { %v1351_v38 = vadd.f32 %v1350_v34, %v1337_v36  ;;  %v1325_v41 = vadd.f32 %v1324_v40, %v1311_v39 }
 0x10b   :  { %1355 = vst [vmem:[%s2584_s2] sm:$0xff] %v1351_v38 }
 0x10e   :  { %v1338_v42 = vpop.f32.mrf.mxu2 }
 0x10f   :  { %v1339_v43 = vadd.f32 %v1338_v42, %v1325_v41  ;;  %v1352_v44 = vpop.f32.mrf.mxu3 }
 0x111   :  { %v1353_v45 = vadd.f32 %v1352_v44, %v1339_v43 }
 0x113   :  { %1356 = vst [vmem:[%s2584_s2 + $0x8] sm:$0xff] %v1353_v45 }

</bundles_post_ra>
